<compile_context>
chip_gen: v5e
topology: v5e:2x2
jax: 0.10.0
libtpu: 0.0.40
codegen_flags: <defaults>
</compile_context>

<pallas_src>
import functools

import jax
import jax.numpy as jnp
from jax.experimental import pallas as pl
from jax.experimental.pallas import tpu as pltpu

LANE = 128   # lane width
SUB = 16     # bf16 sublane packing


def _round_up(x, m):
    return ((x + m - 1) // m) * m


def _pad_to(a, shape):
    return jnp.pad(a, [(0, s - d) for d, s in zip(a.shape, shape)])


def _default_row_tile():
    """128-row tiles exactly fill v5e's 128-deep MXU; 256 fills v6e/v7x."""
    try:
        kind = jax.devices()[0].device_kind.lower()
        if "v5 lite" in kind or "v5e" in kind or "v5litepod" in kind:
            return 128
    except Exception:
        pass
    return 256


# ----------------------------------------------------------------------------
# Pallas kernel: one grid step == one TM-row tile of flattened graph nodes.
#   GCNConv (block-diag adj) -> relu -> residual -> lin1/relu -> lin2/relu
#   -> lin3 -> softplus, written lane-dense (lane 0 is the real column).
# ----------------------------------------------------------------------------
def gnn_actor_kernel(adj_ref, x_ref,
                     wg_ref, bg_ref,
                     w1_ref, b1_ref,
                     w2_ref, b2_ref,
                     w3_ref, b3_ref,
                     out_ref):
    adj = adj_ref[0]                                     # (TM, TM)  bf16
    x = x_ref[...]                                       # (TM, Cp)  bf16

    # GCNConv: A_blockdiag @ (X @ Wg) + bg, then ReLU (bf16 MXU, f32 acc)
    xw = jnp.dot(x, wg_ref[...], preferred_element_type=jnp.float32)
    h = jnp.dot(adj, xw.astype(jnp.bfloat16),
                preferred_element_type=jnp.float32)      # (TM, Cp)  f32
    h = jnp.maximum(h + bg_ref[...], 0.0)

    # residual add (out + state)
    z = h + x.astype(jnp.float32)

    # lin1 + relu
    z1 = jnp.maximum(
        jnp.dot(z.astype(jnp.bfloat16), w1_ref[...],
                preferred_element_type=jnp.float32) + b1_ref[...], 0.0)

    # lin2 + relu
    z2 = jnp.maximum(
        jnp.dot(z1.astype(jnp.bfloat16), w2_ref[...],
                preferred_element_type=jnp.float32) + b2_ref[...], 0.0)

    # lin3 (padded to 128 output lanes -> lane-dense unmasked store)
    z3 = jnp.dot(z2.astype(jnp.bfloat16), w3_ref[...],
                 preferred_element_type=jnp.float32) + b3_ref[...]

    # numerically stable softplus: max(x, 0) + log1p(exp(-|x|))   (EUP ops)
    out_ref[...] = jnp.maximum(z3, 0.0) + jnp.log1p(jnp.exp(-jnp.abs(z3)))


# ----------------------------------------------------------------------------
# One-time preparation (cache and reuse across forward calls).
# ----------------------------------------------------------------------------
def prepare_params(params):
    """Pad + cast weights to kernel layout ONCE (bf16 matmul operands, f32 biases)."""
    C = params["wg"].shape[0]
    H = params["w1"].shape[1]
    Cp = _round_up(C, LANE)
    Hp = _round_up(H, LANE)
    f32, bf16 = jnp.float32, jnp.bfloat16
    return {
        "wg": _pad_to(params["wg"], (Cp, Cp)).astype(bf16),
        "bg": _pad_to(params["bg"], (1, Cp)).astype(f32),
        "w1": _pad_to(params["w1"], (Cp, Hp)).astype(bf16),
        "b1": _pad_to(params["b1"], (1, Hp)).astype(f32),
        "w2": _pad_to(params["w2"], (Hp, Hp)).astype(bf16),
        "b2": _pad_to(params["b2"], (1, Hp)).astype(f32),
        "w3": _pad_to(params["w3"], (Hp, LANE)).astype(bf16),
        "b3": _pad_to(params["b3"], (1, LANE)).astype(f32),
    }


def prepare_adjacency(adj_per_graph, row_tile):
    """Build per-row-tile block-diagonal normalized adjacency ONCE.

    adj_per_graph: (B, N, N) f32 sym-normalized adjacency per graph.
    Returns (num_tiles, TM, TM) bf16 with one (Np,Np) block per graph on the
    diagonal; graphs never straddle a tile boundary.
    """
    B, N, _ = adj_per_graph.shape
    Np = _round_up(N, SUB)
    G = max(1, row_tile // Np)          # graphs per row tile
    TM = G * Np
    M = B * Np
    num_tiles = _round_up(M, TM) // TM
    B_pad = num_tiles * G

    adj_p = _pad_to(adj_per_graph.astype(jnp.float32), (B_pad, Np, Np))
    adj_r = adj_p.reshape(num_tiles, G, Np, Np)
    eye = jnp.eye(G, dtype=jnp.float32)
    blk = jnp.einsum("tgij,gh->tgihj", adj_r, eye).reshape(num_tiles, TM, TM)
    return blk.astype(jnp.bfloat16)


# ----------------------------------------------------------------------------
# Batched forward wrapper (jitted steady-state path: pad state, pallas_call,
# slice lane 0, add epsilon).
# ----------------------------------------------------------------------------
@functools.partial(jax.jit, static_argnames=("act_dim", "hidden_size"))
def gnn_actor_forward(adj_tiles, state, kparams, act_dim, hidden_size):
    """adj_tiles: (num_tiles, TM, TM) bf16 block-diag adjacency (precomputed).
       state:     (B, N, C) node features.
       kparams:   prepared (padded/cast) weights from prepare_params.
       Returns Dirichlet concentrations of shape (B, N // act_dim, act_dim)."""
    B, N, C = state.shape
    H = hidden_size
    Np = _round_up(N, SUB)
    Cp = kparams["wg"].shape[0]
    Hp = kparams["w1"].shape[1]

    num_tiles, TM, _ = adj_tiles.shape
    assert TM % Np == 0, "row tile must be a multiple of the padded graph size"
    M_pad = num_tiles * TM
    assert B * Np <= M_pad, "adjacency tiles were built for fewer graphs"

    xs = _pad_to(state.astype(jnp.float32), (B, Np, Cp)).reshape(B * Np, Cp)
    xs = _pad_to(xs, (M_pad, Cp)).astype(jnp.bfloat16)

    in_specs = [
        pl.BlockSpec((1, TM, TM), lambda t: (t, 0, 0)),   # per-tile block-diag adj
        pl.BlockSpec((TM, Cp), lambda t: (t, 0)),         # per-tile flattened rows
        pl.BlockSpec((Cp, Cp), lambda t: (0, 0)),         # grid-invariant params
        pl.BlockSpec((1, Cp), lambda t: (0, 0)),
        pl.BlockSpec((Cp, Hp), lambda t: (0, 0)),
        pl.BlockSpec((1, Hp), lambda t: (0, 0)),
        pl.BlockSpec((Hp, Hp), lambda t: (0, 0)),
        pl.BlockSpec((1, Hp), lambda t: (0, 0)),
        pl.BlockSpec((Hp, LANE), lambda t: (0, 0)),
        pl.BlockSpec((1, LANE), lambda t: (0, 0)),
    ]
    out_specs = pl.BlockSpec((TM, LANE), lambda t: (t, 0))

    # Cost estimate from REAL (unpadded) dims.
    flops = 2 * B * N * (N * C + C * C + C * H + H * H + H)
    bytes_accessed = int(
        B * N * C * 4 + B * N * N * 2
        + (C * C + C * H + H * H + H) * 2 + (C + 2 * H + 1) * 4
        + B * N * 4)
    cost = pl.CostEstimate(flops=flops,
                           transcendentals=2 * B * N,
                           bytes_accessed=bytes_accessed)

    out = pl.pallas_call(
        gnn_actor_kernel,
        out_shape=jax.ShapeDtypeStruct((M_pad, LANE), jnp.float32),
        grid_spec=pltpu.PrefetchScalarGridSpec(
            num_scalar_prefetch=0,
            grid=(num_tiles,),
            in_specs=in_specs,
            out_specs=out_specs,
        ),
        compiler_params=pltpu.CompilerParams(
            dimension_semantics=("parallel",)),   # >=128-row tiles per TC on v7x
        cost_estimate=cost,
    )(adj_tiles, xs,
      kparams["wg"], kparams["bg"],
      kparams["w1"], kparams["b1"],
      kparams["w2"], kparams["b2"],
      kparams["w3"], kparams["b3"])

    # lane 0 holds the real lin3 column; drop node/row padding, add epsilon once.
    conc = out[:B * Np, 0].reshape(B, Np)[:, :N] + 1e-20
    return conc.reshape(B, N // act_dim, act_dim)


# ----------------------------------------------------------------------------
# Glue: dense GCN normalization from edge_index (A_hat = A + I, sym. norm).
# Built ONCE for a static graph and reused across forward calls.
# TODO(synk): sparse edge_index scatter has no clean Pallas TPU equivalent; it
# stays as one-time plain-JAX glue feeding a dense normalized adjacency.
# ----------------------------------------------------------------------------
def build_gcn_norm_adj(edge_index, num_nodes):
    src, dst = edge_index[0], edge_index[1]
    A = jnp.zeros((num_nodes, num_nodes), jnp.float32).at[dst, src].set(1.0)
    A = A + jnp.eye(num_nodes, dtype=jnp.float32)          # add self loops
    deg = A.sum(axis=1)
    dinv = jnp.where(deg > 0, 1.0 / jnp.sqrt(deg), 0.0)
    return dinv[:, None] * A * dinv[None, :]


def init_params(key, in_channels, hidden_size):
    ks = jax.random.split(key, 8)
    scale = 0.1
    return {
        # GCNConv weight stored already-transposed: (in, out)
        "wg": scale * jax.random.normal(ks[0], (in_channels, in_channels), jnp.float32),
        "bg": scale * jax.random.normal(ks[1], (1, in_channels), jnp.float32),
        "w1": scale * jax.random.normal(ks[2], (in_channels, hidden_size), jnp.float32),
        "b1": scale * jax.random.normal(ks[3], (1, hidden_size), jnp.float32),
        "w2": scale * jax.random.normal(ks[4], (hidden_size, hidden_size), jnp.float32),
        "b2": scale * jax.random.normal(ks[5], (1, hidden_size), jnp.float32),
        "w3": scale * jax.random.normal(ks[6], (hidden_size, 1), jnp.float32),
        "b3": scale * jax.random.normal(ks[7], (1, 1), jnp.float32),
    }


if __name__ == "__main__":
    in_channels = 4
    hidden_size = 32
    act_dim = 6
    n_regions = 2                       # regions per graph
    num_nodes = n_regions * act_dim     # 12 nodes per graph
    n_graphs = 16                       # 16 graphs * 16 padded nodes = 256 rows

    key = jax.random.PRNGKey(0)
    k_state, k_params = jax.random.split(key)

    # node features for a batch of graphs: (B, N, C)
    state = jax.random.normal(
        k_state, (n_graphs, num_nodes, in_channels), jnp.float32)

    # deterministic undirected ring graph as edge_index (2, E), shared topology
    idx = jnp.arange(num_nodes)
    src = jnp.concatenate([idx, (idx + 1) % num_nodes])
    dst = jnp.concatenate([(idx + 1) % num_nodes, idx])
    edge_index = jnp.stack([src, dst], axis=0)

    # --- one-time setup (static graph / static weights), reused every call ---
    adj_norm = build_gcn_norm_adj(edge_index, num_nodes)
    adj_batched = jnp.broadcast_to(adj_norm, (n_graphs, num_nodes, num_nodes))

    row_tile = _default_row_tile()                       # 256 (v6e/v7x) / 128 (v5e)
    adj_tiles = prepare_adjacency(adj_batched, row_tile)  # (num_tiles, TM, TM) bf16
    params = init_params(k_params, in_channels, hidden_size)
    kparams = prepare_params(params)                     # padded/cast once

    # --- steady-state call ---
    concentration = gnn_actor_forward(adj_tiles, state, kparams,
                                      act_dim=act_dim, hidden_size=hidden_size)
    jax.block_until_ready(concentration)

    assert concentration.shape == (n_graphs, n_regions, act_dim)
    assert bool(jnp.all(jnp.isfinite(concentration)))
    assert bool(jnp.all(concentration > 0.0))
    print("KERNEL_OK")
</pallas_src>

<mosaic_0001>
module attributes {stable_mosaic.version = 11 : i64} {
  func.func @gnn_actor_kernel(%arg0: i32, %arg1: memref<1x256x256xbf16, #tpu.memory_space<vmem>>, %arg2: memref<256x128xbf16, #tpu.memory_space<vmem>>, %arg3: memref<128x128xbf16, #tpu.memory_space<vmem>>, %arg4: memref<1x128xf32, #tpu.memory_space<vmem>>, %arg5: memref<128x128xbf16, #tpu.memory_space<vmem>>, %arg6: memref<1x128xf32, #tpu.memory_space<vmem>>, %arg7: memref<128x128xbf16, #tpu.memory_space<vmem>>, %arg8: memref<1x128xf32, #tpu.memory_space<vmem>>, %arg9: memref<128x128xbf16, #tpu.memory_space<vmem>>, %arg10: memref<1x128xf32, #tpu.memory_space<vmem>>, %arg11: memref<256x128xf32, #tpu.memory_space<vmem>>) attributes {dimension_semantics = [#tpu.dimension_semantics<parallel>], iteration_bounds = array<i64: 1>, scalar_prefetch = 0 : i64, scratch_operands = 0 : i64, tpu.core_type = #tpu.core_type<tc>, window_params = [{transform_indices = @transform_0, window_bounds = array<i64: 1, 256, 256>}, {transform_indices = @transform_1, window_bounds = array<i64: 256, 128>}, {pipeline_mode = #tpu.pipeline_mode<synchronous>, transform_indices = @transform_2, window_bounds = array<i64: 128, 128>}, {pipeline_mode = #tpu.pipeline_mode<synchronous>, transform_indices = @transform_3, window_bounds = array<i64: 1, 128>}, {pipeline_mode = #tpu.pipeline_mode<synchronous>, transform_indices = @transform_4, window_bounds = array<i64: 128, 128>}, {pipeline_mode = #tpu.pipeline_mode<synchronous>, transform_indices = @transform_5, window_bounds = array<i64: 1, 128>}, {pipeline_mode = #tpu.pipeline_mode<synchronous>, transform_indices = @transform_6, window_bounds = array<i64: 128, 128>}, {pipeline_mode = #tpu.pipeline_mode<synchronous>, transform_indices = @transform_7, window_bounds = array<i64: 1, 128>}, {pipeline_mode = #tpu.pipeline_mode<synchronous>, transform_indices = @transform_8, window_bounds = array<i64: 128, 128>}, {pipeline_mode = #tpu.pipeline_mode<synchronous>, transform_indices = @transform_9, window_bounds = array<i64: 1, 128>}, {transform_indices = @transform_10, window_bounds = array<i64: 256, 128>}]} {
    %c0 = arith.constant 0 : index
    %c0_0 = arith.constant 0 : index
    %c0_1 = arith.constant 0 : index
    %0 = vector.load %arg1[%c0, %c0_0, %c0_1] : memref<1x256x256xbf16, #tpu.memory_space<vmem>>, vector<1x256x256xbf16>
    %1 = vector.shape_cast %0 : vector<1x256x256xbf16> to vector<256x256xbf16>
    %c0_2 = arith.constant 0 : index
    %c0_3 = arith.constant 0 : index
    %2 = vector.load %arg2[%c0_2, %c0_3] : memref<256x128xbf16, #tpu.memory_space<vmem>>, vector<256x128xbf16>
    %c0_4 = arith.constant 0 : index
    %c0_5 = arith.constant 0 : index
    %3 = vector.load %arg3[%c0_4, %c0_5] : memref<128x128xbf16, #tpu.memory_space<vmem>>, vector<128x128xbf16>
    %cst = arith.constant dense<0.000000e+00> : vector<256x128xf32>
    %4 = tpu.matmul %2, %3, %cst {dimension_numbers = #tpu.dot_dimension_numbers<[1], [0], [0], [1], [0, 0, 1, 1], [], []>} : vector<256x128xbf16>, vector<128x128xbf16>, vector<256x128xf32> -> vector<256x128xf32>
    %5 = arith.truncf %4 : vector<256x128xf32> to vector<256x128xbf16>
    %cst_6 = arith.constant dense<0.000000e+00> : vector<256x128xf32>
    %6 = tpu.matmul %1, %5, %cst_6 {dimension_numbers = #tpu.dot_dimension_numbers<[1], [0], [0], [1], [0, 0, 1, 1], [], []>} : vector<256x256xbf16>, vector<256x128xbf16>, vector<256x128xf32> -> vector<256x128xf32>
    %c0_7 = arith.constant 0 : index
    %c0_8 = arith.constant 0 : index
    %7 = vector.load %arg4[%c0_7, %c0_8] : memref<1x128xf32, #tpu.memory_space<vmem>>, vector<1x128xf32>
    %8 = vector.broadcast %7 : vector<1x128xf32> to vector<256x128xf32>
    %9 = arith.addf %6, %8 : vector<256x128xf32>
    %cst_9 = arith.constant 0.000000e+00 : f32
    %10 = vector.broadcast %cst_9 : f32 to vector<256x128xf32>
    %11 = arith.maximumf %9, %10 : vector<256x128xf32>
    %12 = arith.extf %2 : vector<256x128xbf16> to vector<256x128xf32>
    %13 = arith.addf %11, %12 : vector<256x128xf32>
    %14 = arith.truncf %13 : vector<256x128xf32> to vector<256x128xbf16>
    %c0_10 = arith.constant 0 : index
    %c0_11 = arith.constant 0 : index
    %15 = vector.load %arg5[%c0_10, %c0_11] : memref<128x128xbf16, #tpu.memory_space<vmem>>, vector<128x128xbf16>
    %cst_12 = arith.constant dense<0.000000e+00> : vector<256x128xf32>
    %16 = tpu.matmul %14, %15, %cst_12 {dimension_numbers = #tpu.dot_dimension_numbers<[1], [0], [0], [1], [0, 0, 1, 1], [], []>} : vector<256x128xbf16>, vector<128x128xbf16>, vector<256x128xf32> -> vector<256x128xf32>
    %c0_13 = arith.constant 0 : index
    %c0_14 = arith.constant 0 : index
    %17 = vector.load %arg6[%c0_13, %c0_14] : memref<1x128xf32, #tpu.memory_space<vmem>>, vector<1x128xf32>
    %18 = vector.broadcast %17 : vector<1x128xf32> to vector<256x128xf32>
    %19 = arith.addf %16, %18 : vector<256x128xf32>
    %cst_15 = arith.constant 0.000000e+00 : f32
    %20 = vector.broadcast %cst_15 : f32 to vector<256x128xf32>
    %21 = arith.maximumf %19, %20 : vector<256x128xf32>
    %22 = arith.truncf %21 : vector<256x128xf32> to vector<256x128xbf16>
    %c0_16 = arith.constant 0 : index
    %c0_17 = arith.constant 0 : index
    %23 = vector.load %arg7[%c0_16, %c0_17] : memref<128x128xbf16, #tpu.memory_space<vmem>>, vector<128x128xbf16>
    %cst_18 = arith.constant dense<0.000000e+00> : vector<256x128xf32>
    %24 = tpu.matmul %22, %23, %cst_18 {dimension_numbers = #tpu.dot_dimension_numbers<[1], [0], [0], [1], [0, 0, 1, 1], [], []>} : vector<256x128xbf16>, vector<128x128xbf16>, vector<256x128xf32> -> vector<256x128xf32>
    %c0_19 = arith.constant 0 : index
    %c0_20 = arith.constant 0 : index
    %25 = vector.load %arg8[%c0_19, %c0_20] : memref<1x128xf32, #tpu.memory_space<vmem>>, vector<1x128xf32>
    %26 = vector.broadcast %25 : vector<1x128xf32> to vector<256x128xf32>
    %27 = arith.addf %24, %26 : vector<256x128xf32>
    %cst_21 = arith.constant 0.000000e+00 : f32
    %28 = vector.broadcast %cst_21 : f32 to vector<256x128xf32>
    %29 = arith.maximumf %27, %28 : vector<256x128xf32>
    %30 = arith.truncf %29 : vector<256x128xf32> to vector<256x128xbf16>
    %c0_22 = arith.constant 0 : index
    %c0_23 = arith.constant 0 : index
    %31 = vector.load %arg9[%c0_22, %c0_23] : memref<128x128xbf16, #tpu.memory_space<vmem>>, vector<128x128xbf16>
    %cst_24 = arith.constant dense<0.000000e+00> : vector<256x128xf32>
    %32 = tpu.matmul %30, %31, %cst_24 {dimension_numbers = #tpu.dot_dimension_numbers<[1], [0], [0], [1], [0, 0, 1, 1], [], []>} : vector<256x128xbf16>, vector<128x128xbf16>, vector<256x128xf32> -> vector<256x128xf32>
    %c0_25 = arith.constant 0 : index
    %c0_26 = arith.constant 0 : index
    %33 = vector.load %arg10[%c0_25, %c0_26] : memref<1x128xf32, #tpu.memory_space<vmem>>, vector<1x128xf32>
    %34 = vector.broadcast %33 : vector<1x128xf32> to vector<256x128xf32>
    %35 = arith.addf %32, %34 : vector<256x128xf32>
    %cst_27 = arith.constant 0.000000e+00 : f32
    %36 = vector.broadcast %cst_27 : f32 to vector<256x128xf32>
    %37 = arith.maximumf %35, %36 : vector<256x128xf32>
    %38 = math.absf %35 : vector<256x128xf32>
    %cst_28 = arith.constant 0.000000e+00 : f32
    %39 = vector.broadcast %cst_28 : f32 to vector<256x128xf32>
    %40 = arith.subf %39, %38 : vector<256x128xf32>
    %41 = math.exp %40 : vector<256x128xf32>
    %42 = math.log1p %41 : vector<256x128xf32>
    %43 = arith.addf %37, %42 : vector<256x128xf32>
    %c0_29 = arith.constant 0 : index
    %c0_30 = arith.constant 0 : index
    %44 = vector.load %arg11[%c0_29, %c0_30] : memref<256x128xf32, #tpu.memory_space<vmem>>, vector<256x128xf32>
    tpu.vector_store %arg11[%c0_29, %c0_30], %43 {strides = array<i32>} : memref<256x128xf32, #tpu.memory_space<vmem>>, vector<256x128xf32>,
    return
  }
  func.func @transform_0(%arg0: i32) -> (i32, i32, i32) {
    %c0_i32 = arith.constant 0 : i32
    %c0_i32_0 = arith.constant 0 : i32
    %c0_i32_1 = arith.constant 0 : i32
    return %arg0, %c0_i32, %c0_i32_0 : i32, i32, i32
  }
  func.func @transform_1(%arg0: i32) -> (i32, i32) {
    %c0_i32 = arith.constant 0 : i32
    %c0_i32_0 = arith.constant 0 : i32
    return %arg0, %c0_i32 : i32, i32
  }
  func.func @transform_2(%arg0: i32) -> (i32, i32) {
    %c0_i32 = arith.constant 0 : i32
    %c0_i32_0 = arith.constant 0 : i32
    %c0_i32_1 = arith.constant 0 : i32
    return %c0_i32, %c0_i32_0 : i32, i32
  }
  func.func @transform_3(%arg0: i32) -> (i32, i32) {
    %c0_i32 = arith.constant 0 : i32
    %c0_i32_0 = arith.constant 0 : i32
    %c0_i32_1 = arith.constant 0 : i32
    return %c0_i32, %c0_i32_0 : i32, i32
  }
  func.func @transform_4(%arg0: i32) -> (i32, i32) {
    %c0_i32 = arith.constant 0 : i32
    %c0_i32_0 = arith.constant 0 : i32
    %c0_i32_1 = arith.constant 0 : i32
    return %c0_i32, %c0_i32_0 : i32, i32
  }
  func.func @transform_5(%arg0: i32) -> (i32, i32) {
    %c0_i32 = arith.constant 0 : i32
    %c0_i32_0 = arith.constant 0 : i32
    %c0_i32_1 = arith.constant 0 : i32
    return %c0_i32, %c0_i32_0 : i32, i32
  }
  func.func @transform_6(%arg0: i32) -> (i32, i32) {
    %c0_i32 = arith.constant 0 : i32
    %c0_i32_0 = arith.constant 0 : i32
    %c0_i32_1 = arith.constant 0 : i32
    return %c0_i32, %c0_i32_0 : i32, i32
  }
  func.func @transform_7(%arg0: i32) -> (i32, i32) {
    %c0_i32 = arith.constant 0 : i32
    %c0_i32_0 = arith.constant 0 : i32
    %c0_i32_1 = arith.constant 0 : i32
    return %c0_i32, %c0_i32_0 : i32, i32
  }
  func.func @transform_8(%arg0: i32) -> (i32, i32) {
    %c0_i32 = arith.constant 0 : i32
    %c0_i32_0 = arith.constant 0 : i32
    %c0_i32_1 = arith.constant 0 : i32
    return %c0_i32, %c0_i32_0 : i32, i32
  }
  func.func @transform_9(%arg0: i32) -> (i32, i32) {
    %c0_i32 = arith.constant 0 : i32
    %c0_i32_0 = arith.constant 0 : i32
    %c0_i32_1 = arith.constant 0 : i32
    return %c0_i32, %c0_i32_0 : i32, i32
  }
  func.func @transform_10(%arg0: i32) -> (i32, i32) {
    %c0_i32 = arith.constant 0 : i32
    %c0_i32_0 = arith.constant 0 : i32
    return %arg0, %c0_i32 : i32, i32
  }
}

</mosaic_0001>

<bundles_post_ra>
// kernel: squeeze.1
= control target key start
LH: loop header
LB: loop body
LE: loop exit
PB: predicated region body
PF: predicated region fallthrough
CT: control target
= control target key end

     0   :  { %s66_s8 = smov 80   ;;  %s67_s9 = smov 48   ;;  %vm7_vm0 = vcmask 130048   ;;  %s117_s0 = inlined_call_operand.vmem [shape: f32[256], index: 0, kind: input, shape index: {}]   ;;  %s118_s1 = inlined_call_operand.vmem [shape: f32[16,16], index: 1, kind: output, shape index: {}]  }
   0x1   :  { %v4_v0 = vld [vmem:[%s117_s0] sm:$0x3]  ;;  %s65_s0 = smov 112   ;;  %s68_s10 = smov 96  }
   0x2   :  { %5 = vst [vmem:[#allocation0] sm:$0x3] %v4_v0  ;;  %s69_s11 = smov 64   ;;  %s70_s12 = smov 32  }
   0x3   :  { %s71_s13 = smov 16  }
   0x9   :  { %v9_v1 = vld [vmem:[#allocation0] sm:$0x3]  }
   0xa   :  { %v21_v2 = vld [vmem:[#allocation0] sm:$0x3]   ;;  %10 = vrot.lane.b32.xlu0 %v9_v1, %s65_s0 }
   0xb   :  { %22 = vrot.lane.b32.xlu1 %v21_v2, %s66_s8  ;;  %v33_v3 = vld [vmem:[#allocation0] sm:$0x3]  }
   0xc   :  { %34 = vrot.lane.b32.xlu2 %v33_v3, %s67_s9  ;;  %v15_v4 = vld [vmem:[#allocation0] sm:$0x3]  }
   0xd   :  { %v27_v5 = vld [vmem:[#allocation0] sm:$0x3]  }
   0xe   :  { %v39_v6 = vld [vmem:[#allocation0] sm:$0x3]  }
   0xf   :  { %v45_v7 = vld [vmem:[#allocation0] sm:$0x3]  }
  0x10   :  { %v6_v8 = vld [vmem:[#allocation0] sm:$0x3]  }
  0x11   :  { %8 = vst.msk [vmem:[%s118_s1] ss:$8 sm:$0x3] %vm7_vm0, %v6_v8  }
  0x12   :  { %16 = vrot.lane.b32.xlu0 %v15_v4, %s68_s10 }
  0x13   :  { %28 = vrot.lane.b32.xlu1 %v27_v5, %s69_s11 }
  0x14   :  { %40 = vrot.lane.b32.xlu2 %v39_v6, %s70_s12 }
  0x1a   :  { %46 = vrot.lane.b32.xlu0 %v45_v7, %s71_s13 }
  0x66   :  { %v35_v9 = vpop.permute.xlu2 %34  }
  0x67   :  { %55 = vst.msk [vmem:[%s118_s1 + $0x5] ss:$8 sm:$0x3] %vm7_vm0, %v35_v9  }
  0x6e   :  { %v41_v10 = vpop.permute.xlu2 %40  }
  0x6f   :  { %56 = vst.msk [vmem:[%s118_s1 + $0x6] ss:$8 sm:$0x3] %vm7_vm0, %v41_v10  }
  0x7c   :  { %v11_v11 = vpop.permute.xlu0 %10  }
  0x7d   :  { %v23_v12 = vpop.permute.xlu1 %22   ;;  %51 = vst.msk [vmem:[%s118_s1 + $0x1] ss:$8 sm:$0x3] %vm7_vm0, %v11_v11  }
  0x7e   :  { %53 = vst.msk [vmem:[%s118_s1 + $0x3] ss:$8 sm:$0x3] %vm7_vm0, %v23_v12  }
  0x84   :  { %v17_v13 = vpop.permute.xlu0 %16  }
  0x85   :  { %v29_v14 = vpop.permute.xlu1 %28   ;;  %52 = vst.msk [vmem:[%s118_s1 + $0x2] ss:$8 sm:$0x3] %vm7_vm0, %v17_v13  }
  0x86   :  { %54 = vst.msk [vmem:[%s118_s1 + $0x4] ss:$8 sm:$0x3] %vm7_vm0, %v29_v14  }
  0x8c   :  { %v47_v15 = vpop.permute.xlu0 %46  }
  0x8d   :  { %57 = vst.msk [vmem:[%s118_s1 + $0x7] ss:$8 sm:$0x3] %vm7_vm0, %v47_v15  }

// kernel: gnn_actor_forward.1
= control target key start
LH: loop header
LB: loop body
LE: loop exit
PB: predicated region body
PF: predicated region fallthrough
CT: control target
= control target key end

     0   :  { %15 = vsyncpa [#allocation3], 0  ;;  %s2496_s16 = smov [#allocation2]   ;;  %s2497_s18 = smov 64   ;;  %s3348_s0 = inlined_call_operand.vmem [shape: bf16[1,256,256], index: 0, kind: input, shape index: {}]   ;;  %s3349_s1 = inlined_call_operand.vmem [shape: bf16[256,128], index: 1, kind: input, shape index: {}]   ;;  %s3350_s2 = inlined_call_operand.vmem [shape: bf16[128,128], index: 2, kind: input, shape index: {}]   ;;  %s3351_s3 = inlined_call_operand.vmem [shape: f32[1,128], index: 3, kind: input, shape index: {}]   ;;  %s3352_s4 = inlined_call_operand.vmem [shape: bf16[128,128], index: 4, kind: input, shape index: {}]   ;;  %s3353_s5 = inlined_call_operand.vmem [shape: f32[1,128], index: 5, kind: input, shape index: {}]   ;;  %s3354_s6 = inlined_call_operand.vmem [shape: bf16[128,128], index: 6, kind: input, shape index: {}]   ;;  %s3355_s7 = inlined_call_operand.vmem [shape: f32[1,128], index: 7, kind: input, shape index: {}]   ;;  %s3356_s8 = inlined_call_operand.hbm [shape: bf16[128,128], index: 8, kind: input, shape index: {}]   ;;  %s3357_s9 = inlined_call_operand.vmem [shape: f32[1,128], index: 9, kind: input, shape index: {}]   ;;  %s3358_s10 = inlined_call_operand.vmem [shape: f32[256,128], index: 10, kind: output, shape index: {}]  }
   0x1   :  { %s36_s15 = sshll.u32 %s3356_s8, 4  ;;  %s38_s17 = sshll.u32 %s2496_s16, 4  ;;  %s37_s15 = int_to_ptr.hbm [resolvable:$true] %s36_s15  ;;  %s39_s17 = int_to_ptr.vmem [resolvable:$true] %s38_s17 }
   0x2   :  { %s2498_s19 = smov 4  }
   0x3   :  { %44 = dma.hbm_to_vmem [thread:$0]  %s37_s15, 1024, %s39_s17, [#allocation3], %s2497_s18, %s2497_s18, %s2498_s19  }
   0x4   :  { %2494 = dma.done.wait [#allocation3], 1024  }
   0x5   :  { %2495 = vsyncadd [#allocation3], 4294966272  ;;  %v2293_v0 = vld [vmem:[%s3350_s2 + $0x38] sm:$0xff]  ;;  %v2292_v1 = vld [vmem:[%s3350_s2 + $0x30] sm:$0xff] }
   0x6   :  { %275 = vmatpush.bf16.msra.mxu0 %v2293_v0  ;;  %2318 = vmatpush.bf16.msra.mxu2 %v2293_v0  ;;  %v2291_v2 = vld [vmem:[%s3350_s2 + $0x28] sm:$0xff]  ;;  %v2290_v3 = vld [vmem:[%s3350_s2 + $0x20] sm:$0xff]  ;;  %v2289_v4 = vld [vmem:[%s3350_s2 + $0x18] sm:$0xff] }
   0x7   :  { %v2288_v5 = vld [vmem:[%s3350_s2 + $0x10] sm:$0xff]  ;;  %v2287_v6 = vld [vmem:[%s3350_s2 + $0x8] sm:$0xff]  ;;  %v2286_v7 = vld [vmem:[%s3350_s2] sm:$0xff] }
   0x8   :  { %v2270_v8 = vld [vmem:[%s3349_s1] sm:$0xff]  ;;  %v2271_v10 = vld [vmem:[%s3349_s1 + $0x8] sm:$0xff]  ;;  %v2272_v12 = vld [vmem:[%s3349_s1 + $0x10] sm:$0xff] }
   0x9   :  { %v2278_v9 = vld [vmem:[%s3349_s1 + $0x40] sm:$0xff]  ;;  %v2279_v11 = vld [vmem:[%s3349_s1 + $0x48] sm:$0xff]  ;;  %v2280_v13 = vld [vmem:[%s3349_s1 + $0x50] sm:$0xff] }
   0xa   :  { %276 = vmatpush.bf16.msra.mxu0 %v2292_v1  ;;  %2319 = vmatpush.bf16.msra.mxu2 %v2292_v1  ;;  %v2273_v14 = vld [vmem:[%s3349_s1 + $0x18] sm:$0xff]  ;;  %v2274_v16 = vld [vmem:[%s3349_s1 + $0x20] sm:$0xff]  ;;  %v2275_v18 = vld [vmem:[%s3349_s1 + $0x28] sm:$0xff] }
   0xb   :  { %v2281_v15 = vld [vmem:[%s3349_s1 + $0x58] sm:$0xff]  ;;  %v2282_v17 = vld [vmem:[%s3349_s1 + $0x60] sm:$0xff]  ;;  %v2283_v19 = vld [vmem:[%s3349_s1 + $0x68] sm:$0xff] }
   0xc   :  { %v2276_v20 = vld [vmem:[%s3349_s1 + $0x30] sm:$0xff]  ;;  %v2277_v22 = vld [vmem:[%s3349_s1 + $0x38] sm:$0xff] }
   0xd   :  { %v2284_v21 = vld [vmem:[%s3349_s1 + $0x70] sm:$0xff]  ;;  %v2285_v23 = vld [vmem:[%s3349_s1 + $0x78] sm:$0xff] }
   0xe   :  { %277 = vmatpush.bf16.msra.mxu0 %v2291_v2  ;;  %2320 = vmatpush.bf16.msra.mxu2 %v2291_v2 }
  0x12   :  { %278 = vmatpush.bf16.msra.mxu0 %v2290_v3  ;;  %2321 = vmatpush.bf16.msra.mxu2 %v2290_v3 }
  0x16   :  { %279 = vmatpush.bf16.msra.mxu0 %v2289_v4  ;;  %2322 = vmatpush.bf16.msra.mxu2 %v2289_v4  ;;  %v2016_v4 = vld [vmem:[%s3348_s0] sm:$0xf] }
  0x1a   :  { %280 = vmatpush.bf16.msra.mxu0 %v2288_v5  ;;  %2323 = vmatpush.bf16.msra.mxu2 %v2288_v5 }
  0x1e   :  { %281 = vmatpush.bf16.msra.mxu0 %v2287_v6  ;;  %2324 = vmatpush.bf16.msra.mxu2 %v2287_v6  ;;  %v2239_v6 = vld [vmem:[%s3348_s0 + $0x4] sm:$0xf0] }
  0x22   :  { %282 = vmatpush.bf16.msra.mxu0 %v2286_v7  ;;  %2325 = vmatpush.bf16.msra.mxu2 %v2286_v7  ;;  %v2080_v7 = vld [vmem:[%s3348_s0 + $0x80] sm:$0xf] }
  0x25   :  { %283 = vmatmul.bf16.vlgmr.msra.gmra.mxu0 %v2270_v8  ;;  %323 = vmatmul.bf16.vlgmr.msra.gmra.mxu2 %v2278_v9  ;;  %v2255_v8 = vld [vmem:[%s3348_s0 + $0x84] sm:$0xf0] }
  0x35   :  { %288 = vmatmul.bf16.gmra.mxu0 %v2271_v10  ;;  %328 = vmatmul.bf16.gmra.mxu2 %v2279_v11  ;;  %v2017_v10 = vor.u32 %v2239_v6, %v2016_v4  ;;  %v2081_v11 = vor.u32 %v2255_v8, %v2080_v7  ;;  %v2299_v6 = vld [vmem:[%s3352_s4 + $0x28] sm:$0xff]  ;;  %v2250_v7 = vld [vmem:[%s3348_s0 + $0x64] sm:$0xf] }
  0x36   :  { %v2066_v8 = vld [vmem:[%s3348_s0 + $0x68] sm:$0xf0] }
  0x45   :  { %293 = vmatmul.bf16.gmra.mxu0 %v2272_v12  ;;  %333 = vmatmul.bf16.gmra.mxu2 %v2280_v13  ;;  %v2238_v13 = vld [vmem:[%s3348_s0 + $0x4] sm:$0xf] }
  0x55   :  { %298 = vmatmul.bf16.gmra.mxu0 %v2273_v14  ;;  %338 = vmatmul.bf16.gmra.mxu2 %v2281_v15  ;;  %v2018_v14 = vld [vmem:[%s3348_s0 + $0x8] sm:$0xf0] }
  0x65   :  { %303 = vmatmul.bf16.gmra.mxu0 %v2274_v16  ;;  %343 = vmatmul.bf16.gmra.mxu2 %v2282_v17  ;;  %v2021_v16 = vor.u32 %v2238_v13, %v2018_v14  ;;  %v2024_v17 = vld [vmem:[%s3348_s0 + $0x10] sm:$0xf]  ;;  %v2269_v14 = vld [vmem:[%s3348_s0 + $0xf4] sm:$0xf0] }
  0x66   :  { %v2136_v13 = vld [vmem:[%s3348_s0 + $0xf0] sm:$0xf] }
  0x75   :  { %308 = vmatmul.bf16.gmra.mxu0 %v2275_v18  ;;  %348 = vmatmul.bf16.gmra.mxu2 %v2283_v19  ;;  %v2241_v18 = vld [vmem:[%s3348_s0 + $0x14] sm:$0xf0]  ;;  %v2088_v19 = vld [vmem:[%s3348_s0 + $0x90] sm:$0xf] }
  0x85   :  { %313 = vmatmul.bf16.gmra.mxu0 %v2276_v20  ;;  %353 = vmatmul.bf16.gmra.mxu2 %v2284_v21  ;;  %v2257_v20 = vld [vmem:[%s3348_s0 + $0x94] sm:$0xf0]  ;;  %v2025_v21 = vor.u32 %v2241_v18, %v2024_v17  ;;  %v2137_v17 = vor.u32 %v2269_v14, %v2136_v13  ;;  %v2296_v18 = vld [vmem:[%s3352_s4 + $0x10] sm:$0xff] }
  0x86   :  { %v2260_v14 = vld [vmem:[%s3348_s0 + $0xb4] sm:$0xf] }
  0x95   :  { %318 = vmatmul.bf16.gmra.mxu0 %v2277_v22  ;;  %358 = vmatmul.bf16.gmra.mxu2 %v2285_v23  ;;  %v2089_v22 = vor.u32 %v2257_v20, %v2088_v19  ;;  %v2240_v23 = vld [vmem:[%s3348_s0 + $0x14] sm:$0xf]  ;;  %v2074_v20 = vld [vmem:[%s3348_s0 + $0x78] sm:$0xf0] }
  0x96   :  { %v2252_v19 = vld [vmem:[%s3348_s0 + $0x74] sm:$0xf] }
  0xa2   :  { %v2629_v24 = vpop.f32.mrf.mxu0 }
  0xa8   :  { %v2631_v25 = vpop.f32.mrf.mxu2 }
  0xaa   :  { %v2633_v26 = vpop.f32.mrf.mxu0 }
  0xab   :  { %v364_v9 = vpack.c.bf16 %v2633_v26, %v2629_v24  ;;  %v2026_v24 = vld [vmem:[%s3348_s0 + $0x18] sm:$0xf0]  ;;  %v2032_v26 = vld [vmem:[%s3348_s0 + $0x20] sm:$0xf] }
  0xb0   :  { %v2635_v27 = vpop.f32.mrf.mxu2 }
  0xb1   :  { %v372_v15 = vpack.c.bf16 %v2635_v27, %v2631_v25  ;;  %v2029_v25 = vor.u32 %v2240_v23, %v2026_v24  ;;  %v2243_v27 = vld [vmem:[%s3348_s0 + $0x24] sm:$0xf0]  ;;  %v2294_v23 = vld [vmem:[%s3352_s4] sm:$0xff] }
  0xb2   :  { %v289_v28 = vpop.f32.mrf.mxu0 }
  0xb8   :  { %v2637_v29 = vpop.f32.mrf.mxu2 }
  0xba   :  { %v291_v30 = vpop.f32.mrf.mxu0 }
  0xbb   :  { %v365_v3 = vpack.c.bf16 %v291_v30, %v289_v28  ;;  %v2096_v28 = vld [vmem:[%s3348_s0 + $0xa0] sm:$0xf]  ;;  %v2033_v30 = vor.u32 %v2243_v27, %v2032_v26  ;;  %v2082_v26 = vld [vmem:[%s3348_s0 + $0x88] sm:$0xf0] }
  0xc0   :  { %v2639_v31 = vpop.f32.mrf.mxu2 }
  0xc1   :  { %v373_v12 = vpack.c.bf16 %v2639_v31, %v2637_v29  ;;  %v2259_v29 = vld [vmem:[%s3348_s0 + $0xa4] sm:$0xf0] }
  0xc2   :  { %v294_v32 = vpop.f32.mrf.mxu0  ;;  %v2097_v31 = vor.u32 %v2259_v29, %v2096_v28 }
  0xc8   :  { %v334_v33 = vpop.f32.mrf.mxu2 }
  0xca   :  { %v296_v34 = vpop.f32.mrf.mxu0 }
  0xcb   :  { %v366_v1 = vpack.c.bf16 %v296_v34, %v294_v32  ;;  %v2242_v32 = vld [vmem:[%s3348_s0 + $0x24] sm:$0xf] }
  0xd0   :  { %v336_v35 = vpop.f32.mrf.mxu2 }
  0xd1   :  { %v374_v5 = vpack.c.bf16 %v336_v35, %v334_v33  ;;  %v2034_v33 = vld [vmem:[%s3348_s0 + $0x28] sm:$0xf0]  ;;  %v2040_v35 = vld [vmem:[%s3348_s0 + $0x30] sm:$0xf] }
  0xd2   :  { %v299_v36 = vpop.f32.mrf.mxu0  ;;  %v2037_v34 = vor.u32 %v2242_v32, %v2034_v33 }
  0xd8   :  { %v339_v37 = vpop.f32.mrf.mxu2 }
  0xda   :  { %v301_v38 = vpop.f32.mrf.mxu0 }
  0xdb   :  { %v367_v63 = vpack.c.bf16 %v301_v38, %v299_v36  ;;  %v2245_v36 = vld [vmem:[%s3348_s0 + $0x34] sm:$0xf0] }
  0xdc   :  { %v2261_v38 = vld [vmem:[%s3348_s0 + $0xb4] sm:$0xf0] }
  0xe0   :  { %v341_v39 = vpop.f32.mrf.mxu2 }
  0xe1   :  { %v375_v2 = vpack.c.bf16 %v341_v39, %v339_v37  ;;  %v2104_v37 = vld [vmem:[%s3348_s0 + $0xb0] sm:$0xf]  ;;  %v2041_v39 = vor.u32 %v2245_v36, %v2040_v35  ;;  %v83_v35 = vld [vmem:[%s3349_s1] sm:$0xff]  }
  0xe2   :  { %v304_v40 = vpop.f32.mrf.mxu0 }
  0xe8   :  { %v344_v41 = vpop.f32.mrf.mxu2 }
  0xea   :  { %v306_v42 = vpop.f32.mrf.mxu0 }
  0xeb   :  { %v368_v61 = vpack.c.bf16 %v306_v42, %v304_v40  ;;  %v2105_v40 = vor.u32 %v2261_v38, %v2104_v37  ;;  %v2042_v42 = vld [vmem:[%s3348_s0 + $0x38] sm:$0xf0]  ;;  %v2256_v37 = vld [vmem:[%s3348_s0 + $0x94] sm:$0xf] }
  0xec   :  { %v2090_v38 = vld [vmem:[%s3348_s0 + $0x98] sm:$0xf0] }
  0xf0   :  { %v346_v43 = vpop.f32.mrf.mxu2 }
  0xf1   :  { %v376_v0 = vpack.c.bf16 %v346_v43, %v344_v41  ;;  %v2244_v41 = vld [vmem:[%s3348_s0 + $0x34] sm:$0xf] }
  0xf2   :  { %v309_v44 = vpop.f32.mrf.mxu0  ;;  %v2045_v43 = vor.u32 %v2244_v41, %v2042_v42 }
  0xf8   :  { %v349_v45 = vpop.f32.mrf.mxu2 }
  0xfa   :  { %v311_v46 = vpop.f32.mrf.mxu0 }
  0xfb   :  { %v369_v59 = vpack.c.bf16 %v311_v46, %v309_v44  ;;  %v2048_v44 = vld [vmem:[%s3348_s0 + $0x40] sm:$0xf] }
  0xfc   :  { %v2112_v46 = vld [vmem:[%s3348_s0 + $0xc0] sm:$0xf] }
 0x100   :  { %v351_v47 = vpop.f32.mrf.mxu2 }
 0x101   :  { %v377_v62 = vpack.c.bf16 %v351_v47, %v349_v45  ;;  %v2247_v45 = vld [vmem:[%s3348_s0 + $0x44] sm:$0xf0] }
 0x102   :  { %v314_v48 = vpop.f32.mrf.mxu0  ;;  %v2263_v47 = vld [vmem:[%s3348_s0 + $0xc4] sm:$0xf0] }
 0x108   :  { %v354_v49 = vpop.f32.mrf.mxu2 }
 0x10a   :  { %v316_v50 = vpop.f32.mrf.mxu0 }
 0x10b   :  { %v370_v56 = vpack.c.bf16 %v316_v50, %v314_v48  ;;  %v2049_v48 = vor.u32 %v2247_v45, %v2048_v44  ;;  %v2246_v50 = vld [vmem:[%s3348_s0 + $0x44] sm:$0xf]  ;;  %v755_v44 = vunpack.c.h.bf16 %v83_v35  ;;  %v2093_v45 = vor.u32 %v2256_v37, %v2090_v38 }
 0x10c   :  { %v2262_v38 = vld [vmem:[%s3348_s0 + $0xc4] sm:$0xf] }
 0x110   :  { %v356_v51 = vpop.f32.mrf.mxu2 }
 0x111   :  { %v378_v60 = vpack.c.bf16 %v356_v51, %v354_v49  ;;  %v2113_v49 = vor.u32 %v2263_v47, %v2112_v46  ;;  %v2050_v51 = vld [vmem:[%s3348_s0 + $0x48] sm:$0xf0] }
 0x112   :  { %v319_v52 = vpop.f32.mrf.mxu0 }
 0x118   :  { %v359_v53 = vpop.f32.mrf.mxu2 }
 0x11a   :  { %v321_v54 = vpop.f32.mrf.mxu0 }
 0x11b   :  { %v371_v55 = vpack.c.bf16 %v321_v54, %v319_v52  ;;  %v2053_v52 = vor.u32 %v2246_v50, %v2050_v51  ;;  %v2249_v54 = vld [vmem:[%s3348_s0 + $0x54] sm:$0xf0] }
 0x11d   :  { %544 = vmatpush.bf16.msra.mxu1 %v371_v55  ;;  %2326 = vmatpush.bf16.msra.mxu3 %v371_v55  ;;  %v2120_v55 = vld [vmem:[%s3348_s0 + $0xd0] sm:$0xf] }
 0x120   :  { %v361_v57 = vpop.f32.mrf.mxu2 }
 0x121   :  { %545 = vmatpush.bf16.msra.mxu1 %v370_v56  ;;  %2327 = vmatpush.bf16.msra.mxu3 %v370_v56  ;;  %v379_v58 = vpack.c.bf16 %v361_v57, %v359_v53  ;;  %v2056_v53 = vld [vmem:[%s3348_s0 + $0x50] sm:$0xf]  ;;  %v2265_v56 = vld [vmem:[%s3348_s0 + $0xd4] sm:$0xf0] }
 0x122   :  { %v2057_v57 = vor.u32 %v2249_v54, %v2056_v53 }
 0x123   :  { %633 = vmatpush.bf16.msrb.mxu2 %v379_v58  ;;  %v2121_v58 = vor.u32 %v2265_v56, %v2120_v55  ;;  %v85_v56 = vld [vmem:[%s3349_s1 + $0x8] sm:$0xff]  }
 0x125   :  { %546 = vmatpush.bf16.msra.mxu1 %v369_v59  ;;  %2328 = vmatpush.bf16.msra.mxu3 %v369_v59  ;;  %v2248_v59 = vld [vmem:[%s3348_s0 + $0x54] sm:$0xf] }
 0x127   :  { %634 = vmatpush.bf16.msrb.mxu2 %v378_v60  ;;  %v2058_v60 = vld [vmem:[%s3348_s0 + $0x58] sm:$0xf0] }
 0x129   :  { %547 = vmatpush.bf16.msra.mxu1 %v368_v61  ;;  %2329 = vmatpush.bf16.msra.mxu3 %v368_v61  ;;  %v2061_v61 = vor.u32 %v2248_v59, %v2058_v60  ;;  %v2098_v59 = vld [vmem:[%s3348_s0 + $0xa8] sm:$0xf0] }
 0x12b   :  { %635 = vmatpush.bf16.msrb.mxu2 %v377_v62  ;;  %v2301_v62 = vld [vmem:[%s3352_s4 + $0x38] sm:$0xff] }
 0x12d   :  { %548 = vmatpush.bf16.msra.mxu1 %v367_v63  ;;  %2330 = vmatpush.bf16.msra.mxu3 %v367_v63  ;;  %v2064_v63 = vld [vmem:[%s3348_s0 + $0x60] sm:$0xf] }
 0x12f   :  { %636 = vmatpush.bf16.msrb.mxu2 %v376_v0  ;;  %v2300_v0 = vld [vmem:[%s3352_s4 + $0x30] sm:$0xff] }
 0x131   :  { %549 = vmatpush.bf16.msra.mxu1 %v366_v1  ;;  %2331 = vmatpush.bf16.msra.mxu3 %v366_v1  ;;  %v2251_v1 = vld [vmem:[%s3348_s0 + $0x64] sm:$0xf0] }
 0x132   :  { %v2065_v4 = vor.u32 %v2251_v1, %v2064_v63 }
 0x133   :  { %637 = vmatpush.bf16.msrb.mxu2 %v375_v2  ;;  %v2128_v2 = vld [vmem:[%s3348_s0 + $0xe0] sm:$0xf] }
 0x135   :  { %550 = vmatpush.bf16.msra.mxu1 %v365_v3  ;;  %2332 = vmatpush.bf16.msra.mxu3 %v365_v3  ;;  %v2267_v3 = vld [vmem:[%s3348_s0 + $0xe4] sm:$0xf0] }
 0x137   :  { %638 = vmatpush.bf16.msrb.mxu2 %v374_v5  ;;  %v2129_v5 = vor.u32 %v2267_v3, %v2128_v2  ;;  %v757_v2 = vunpack.c.h.bf16 %v85_v56 }
 0x139   :  { %551 = vmatpush.bf16.msra.mxu1 %v364_v9  ;;  %2333 = vmatpush.bf16.msra.mxu3 %v364_v9  ;;  %v2069_v9 = vor.u32 %v2250_v7, %v2066_v8 }
 0x13b   :  { %639 = vmatpush.bf16.msrb.mxu2 %v373_v12  ;;  %v2253_v12 = vld [vmem:[%s3348_s0 + $0x74] sm:$0xf0] }
 0x13c   :  { %552 = vmatmul.bf16.vlgmr.msra.gmra.mxu1 %v2017_v10  ;;  %592 = vmatmul.bf16.vlgmr.msra.gmra.mxu3 %v2081_v11  ;;  %v2298_v10 = vld [vmem:[%s3352_s4 + $0x20] sm:$0xff]  ;;  %v2072_v11 = vld [vmem:[%s3348_s0 + $0x70] sm:$0xf] }
 0x13d   :  { %902 = vmatpush.bf16.msrb.mxu3 %v2301_v62 }
 0x13f   :  { %640 = vmatpush.bf16.msrb.mxu2 %v372_v15  ;;  %v2297_v15 = vld [vmem:[%s3352_s4 + $0x18] sm:$0xff] }
 0x141   :  { %903 = vmatpush.bf16.msrb.mxu3 %v2300_v0 }
 0x142   :  { %641 = vmatmul.bf16.vlgmr.msrb.gmra.mxu2 %v2021_v16  ;;  %v2073_v16 = vor.u32 %v2253_v12, %v2072_v11  ;;  %v87_v12 = vld [vmem:[%s3349_s1 + $0x10] sm:$0xff]  }
 0x145   :  { %904 = vmatpush.bf16.msrb.mxu3 %v2299_v6 }
 0x149   :  { %905 = vmatpush.bf16.msrb.mxu3 %v2298_v10 }
 0x14c   :  { %557 = vmatmul.bf16.gmra.mxu1 %v2025_v21  ;;  %597 = vmatmul.bf16.gmra.mxu3 %v2089_v22  ;;  %v2295_v21 = vld [vmem:[%s3352_s4 + $0x8] sm:$0xff]  ;;  %v2077_v22 = vor.u32 %v2252_v19, %v2074_v20 }
 0x14d   :  { %906 = vmatpush.bf16.msrb.mxu3 %v2297_v15  ;;  %v2106_v15 = vld [vmem:[%s3348_s0 + $0xb8] sm:$0xf0] }
 0x151   :  { %907 = vmatpush.bf16.msrb.mxu3 %v2296_v18 }
 0x152   :  { %646 = vmatmul.bf16.gmra.mxu2 %v2029_v25  ;;  %v2254_v25 = vld [vmem:[%s3348_s0 + $0x84] sm:$0xf] }
 0x153   :  { %v2085_v27 = vor.u32 %v2254_v25, %v2082_v26 }
 0x155   :  { %908 = vmatpush.bf16.msrb.mxu3 %v2295_v21 }
 0x159   :  { %909 = vmatpush.bf16.msrb.mxu3 %v2294_v23  ;;  %v759_v23 = vunpack.c.h.bf16 %v87_v12 }
 0x15c   :  { %562 = vmatmul.bf16.gmra.mxu1 %v2033_v30  ;;  %602 = vmatmul.bf16.gmra.mxu3 %v2097_v31  ;;  %v2826_v30 = vld [vmem:[%s3351_s3] ss:$0 sm:$0xff] }
 0x162   :  { %651 = vmatmul.bf16.gmra.mxu2 %v2037_v34 }
 0x16c   :  { %567 = vmatmul.bf16.gmra.mxu1 %v2041_v39  ;;  %607 = vmatmul.bf16.gmra.mxu3 %v2105_v40  ;;  %v754_v40 = vunpack.c.l.bf16 %v83_v35 }
 0x172   :  { %656 = vmatmul.bf16.gmra.mxu2 %v2045_v43 }
 0x17c   :  { %572 = vmatmul.bf16.gmra.mxu1 %v2049_v48  ;;  %612 = vmatmul.bf16.gmra.mxu3 %v2113_v49 }
 0x182   :  { %661 = vmatmul.bf16.gmra.mxu2 %v2053_v52 }
 0x18c   :  { %577 = vmatmul.bf16.gmra.mxu1 %v2057_v57  ;;  %617 = vmatmul.bf16.gmra.mxu3 %v2121_v58  ;;  %v2258_v58 = vld [vmem:[%s3348_s0 + $0xa4] sm:$0xf] }
 0x18d   :  { %v2101_v1 = vor.u32 %v2258_v58, %v2098_v59  ;;  %v91_v58 = vld [vmem:[%s3349_s1 + $0x20] sm:$0xff]  }
 0x192   :  { %666 = vmatmul.bf16.gmra.mxu2 %v2061_v61  ;;  %v756_v61 = vunpack.c.l.bf16 %v85_v56 }
 0x19c   :  { %582 = vmatmul.bf16.gmra.mxu1 %v2065_v4  ;;  %622 = vmatmul.bf16.gmra.mxu3 %v2129_v5 }
 0x1a2   :  { %671 = vmatmul.bf16.gmra.mxu2 %v2069_v9 }
 0x1ac   :  { %587 = vmatmul.bf16.gmra.mxu1 %v2073_v16  ;;  %627 = vmatmul.bf16.gmra.mxu3 %v2137_v17  ;;  %v758_v17 = vunpack.c.l.bf16 %v87_v12 }
 0x1b2   :  { %676 = vmatmul.bf16.gmra.mxu2 %v2077_v22  ;;  %v2109_v22 = vor.u32 %v2260_v14, %v2106_v15  ;;  %v93_v15 = vld [vmem:[%s3349_s1 + $0x28] sm:$0xff]  }
 0x1b9   :  { %v553_v24 = vpop.f32.mrf.mxu1 }
 0x1ba   :  { %v554_v32 = vadd.f32 %v2826_v30, %v553_v24 }
 0x1bf   :  { %v2821_v28 = vpop.f32.mrf.mxu3 }
 0x1c1   :  { %v555_v29 = vpop.f32.mrf.mxu1 }
 0x1c2   :  { %681 = vmatmul.bf16.gmra.mxu2 %v2085_v27  ;;  %v556_v39 = vadd.f32 %v2826_v30, %v555_v29 }
 0x1c5   :  { %v642_v31 = vpop.f32.mrf.mxu2 }
 0x1c6   :  { %v643_v36 = vadd.f32 %v642_v31, %v554_v32 }
 0x1c7   :  { %v2829_v33 = vpop.f32.mrf.mxu3 }
 0x1c8   :  { %v722_v42 = vmax.f32 %v643_v36, 0.0  ;;  %v89_v36 = vld [vmem:[%s3349_s1 + $0x18] sm:$0xff]  }
 0x1c9   :  { %v558_v34 = vpop.f32.mrf.mxu1 }
 0x1ca   :  { %v786_v49 = vadd.f32 %v754_v40, %v722_v42  ;;  %v559_v53 = vadd.f32 %v2826_v30, %v558_v34 }
 0x1cd   :  { %v644_v41 = vpop.f32.mrf.mxu2 }
 0x1ce   :  { %v645_v43 = vadd.f32 %v644_v41, %v556_v39  ;;  %v2114_v39 = vld [vmem:[%s3348_s0 + $0xc8] sm:$0xf0]  ;;  %v760_v41 = vunpack.c.l.bf16 %v89_v36 }
 0x1cf   :  { %v2841_v46 = vpop.f32.mrf.mxu3 }
 0x1d0   :  { %v723_v47 = vmax.f32 %v645_v43, 0.0 }
 0x1d1   :  { %v560_v48 = vpop.f32.mrf.mxu1 }
 0x1d2   :  { %v787_v50 = vadd.f32 %v755_v44, %v723_v47  ;;  %686 = vmatmul.bf16.gmra.mxu2 %v2093_v45  ;;  %v561_v60 = vadd.f32 %v2826_v30, %v560_v48  ;;  %v2117_v45 = vor.u32 %v2262_v38, %v2114_v39  ;;  %v761_v47 = vunpack.c.h.bf16 %v89_v36 }
 0x1d4   :  { %v818_v51 = vpack.c.bf16 %v787_v50, %v786_v49 }
 0x1d5   :  { %v647_v52 = vpop.f32.mrf.mxu2 }
 0x1d6   :  { %910 = vmatmul.bf16.vlgmr.msrb.gmra.mxu3 %v818_v51  ;;  %v648_v57 = vadd.f32 %v647_v52, %v559_v53 }
 0x1d7   :  { %v2844_v55 = vpop.f32.mrf.mxu3 }
 0x1d8   :  { %v724_v63 = vmax.f32 %v648_v57, 0.0 }
 0x1d9   :  { %v563_v54 = vpop.f32.mrf.mxu1 }
 0x1da   :  { %v788_v5 = vadd.f32 %v756_v61, %v724_v63  ;;  %v564_v10 = vadd.f32 %v2826_v30, %v563_v54  ;;  %v2122_v61 = vld [vmem:[%s3348_s0 + $0xd8] sm:$0xf0] }
 0x1dd   :  { %v649_v62 = vpop.f32.mrf.mxu2 }
 0x1de   :  { %v650_v0 = vadd.f32 %v649_v62, %v561_v60  ;;  %v2264_v60 = vld [vmem:[%s3348_s0 + $0xd4] sm:$0xf] }
 0x1df   :  { %v2856_v7 = vpop.f32.mrf.mxu3 }
 0x1e0   :  { %v725_v3 = vmax.f32 %v650_v0, 0.0  ;;  %v762_v0 = vunpack.c.l.bf16 %v91_v58 }
 0x1e1   :  { %v565_v4 = vpop.f32.mrf.mxu1 }
 0x1e2   :  { %691 = vmatmul.bf16.gmra.mxu2 %v2101_v1  ;;  %v789_v6 = vadd.f32 %v757_v2, %v725_v3  ;;  %v566_v16 = vadd.f32 %v2826_v30, %v565_v4  ;;  %v763_v4 = vunpack.c.h.bf16 %v91_v58  ;;  %v2307_v58 = vld [vmem:[%s3354_s6 + $0x28] sm:$0xff] }
 0x1e4   :  { %v819_v8 = vpack.c.bf16 %v789_v6, %v788_v5  ;;  %v2125_v5 = vor.u32 %v2264_v60, %v2122_v61 }
 0x1e5   :  { %v652_v9 = vpop.f32.mrf.mxu2 }
 0x1e6   :  { %915 = vmatmul.bf16.gmra.mxu3 %v819_v8  ;;  %v653_v13 = vadd.f32 %v652_v9, %v564_v10 }
 0x1e7   :  { %v2869_v19 = vpop.f32.mrf.mxu3 }
 0x1e8   :  { %v726_v20 = vmax.f32 %v653_v13, 0.0 }
 0x1e9   :  { %v568_v11 = vpop.f32.mrf.mxu1 }
 0x1ea   :  { %v790_v26 = vadd.f32 %v758_v17, %v726_v20  ;;  %v569_v32 = vadd.f32 %v2826_v30, %v568_v11  ;;  %v2266_v17 = vld [vmem:[%s3348_s0 + $0xe4] sm:$0xf] }
 0x1ed   :  { %v654_v18 = vpop.f32.mrf.mxu2 }
 0x1ee   :  { %v655_v21 = vadd.f32 %v654_v18, %v566_v16  ;;  %v2130_v18 = vld [vmem:[%s3348_s0 + $0xe8] sm:$0xf0] }
 0x1ef   :  { %v2872_v34 = vpop.f32.mrf.mxu3 }
 0x1f0   :  { %v727_v24 = vmax.f32 %v655_v21, 0.0 }
 0x1f1   :  { %v570_v25 = vpop.f32.mrf.mxu1 }
 0x1f2   :  { %696 = vmatmul.bf16.gmra.mxu2 %v2109_v22  ;;  %v791_v27 = vadd.f32 %v759_v23, %v727_v24  ;;  %v571_v40 = vadd.f32 %v2826_v30, %v570_v25  ;;  %v764_v22 = vunpack.c.l.bf16 %v93_v15 }
 0x1f4   :  { %v820_v29 = vpack.c.bf16 %v791_v27, %v790_v26  ;;  %v765_v26 = vunpack.c.h.bf16 %v93_v15  ;;  %v2133_v27 = vor.u32 %v2266_v17, %v2130_v18  ;;  %v2303_v18 = vld [vmem:[%s3354_s6 + $0x8] sm:$0xff] }
 0x1f5   :  { %v657_v31 = vpop.f32.mrf.mxu2 }
 0x1f6   :  { %920 = vmatmul.bf16.gmra.mxu3 %v820_v29  ;;  %v658_v37 = vadd.f32 %v657_v31, %v569_v32 }
 0x1f7   :  { %v2884_v50 = vpop.f32.mrf.mxu3 }
 0x1f8   :  { %v728_v43 = vmax.f32 %v658_v37, 0.0 }
 0x1f9   :  { %v573_v35 = vpop.f32.mrf.mxu1 }
 0x1fa   :  { %v792_v51 = vadd.f32 %v760_v41, %v728_v43  ;;  %v574_v56 = vadd.f32 %v2826_v30, %v573_v35 }
 0x1fd   :  { %v659_v42 = vpop.f32.mrf.mxu2 }
 0x1fe   :  { %v660_v44 = vadd.f32 %v659_v42, %v571_v40  ;;  %v2309_v40 = vld [vmem:[%s3354_s6 + $0x38] sm:$0xff]  ;;  %v95_v42 = vld [vmem:[%s3349_s1 + $0x30] sm:$0xff]  }
 0x1ff   :  { %v2896_v62 = vpop.f32.mrf.mxu3  ;;  %1107 = vmatpush.bf16.msrb.mxu0 %v2309_v40 }
 0x200   :  { %v729_v48 = vmax.f32 %v660_v44, 0.0  ;;  %v2268_v44 = vld [vmem:[%s3348_s0 + $0xf4] sm:$0xf] }
 0x201   :  { %v575_v49 = vpop.f32.mrf.mxu1 }
 0x202   :  { %701 = vmatmul.bf16.gmra.mxu2 %v2117_v45  ;;  %v793_v52 = vadd.f32 %v761_v47, %v729_v48  ;;  %v576_v63 = vadd.f32 %v2826_v30, %v575_v49  ;;  %v2138_v45 = vld [vmem:[%s3348_s0 + $0xf8] sm:$0xf0]  ;;  %v2308_v47 = vld [vmem:[%s3354_s6 + $0x30] sm:$0xff]  ;;  %v766_v49 = vunpack.c.l.bf16 %v95_v42 }
 0x203   :  { %1108 = vmatpush.bf16.msrb.mxu0 %v2308_v47 }
 0x204   :  { %v821_v53 = vpack.c.bf16 %v793_v52, %v792_v51 }
 0x205   :  { %v662_v54 = vpop.f32.mrf.mxu2 }
 0x206   :  { %925 = vmatmul.bf16.gmra.mxu3 %v821_v53  ;;  %v663_v59 = vadd.f32 %v662_v54, %v574_v56  ;;  %v767_v54 = vunpack.c.h.bf16 %v95_v42  ;;  %v2141_v56 = vor.u32 %v2268_v44, %v2138_v45 }
 0x207   :  { %v2899_v13 = vpop.f32.mrf.mxu3  ;;  %1109 = vmatpush.bf16.msrb.mxu0 %v2307_v58 }
 0x208   :  { %v730_v2 = vmax.f32 %v663_v59, 0.0 }
 0x209   :  { %v578_v57 = vpop.f32.mrf.mxu1 }
 0x20a   :  { %v794_v9 = vadd.f32 %v762_v0, %v730_v2  ;;  %v579_v14 = vadd.f32 %v2826_v30, %v578_v57  ;;  %v2306_v0 = vld [vmem:[%s3354_s6 + $0x20] sm:$0xff] }
 0x20b   :  { %1110 = vmatpush.bf16.msrb.mxu0 %v2306_v0 }
 0x20d   :  { %v664_v1 = vpop.f32.mrf.mxu2 }
 0x20e   :  { %v665_v3 = vadd.f32 %v664_v1, %v576_v63 }
 0x20f   :  { %v2912_v29 = vpop.f32.mrf.mxu3 }
 0x210   :  { %v731_v6 = vmax.f32 %v665_v3, 0.0 }
 0x211   :  { %v580_v8 = vpop.f32.mrf.mxu1 }
 0x212   :  { %v795_v10 = vadd.f32 %v763_v4, %v731_v6  ;;  %706 = vmatmul.bf16.gmra.mxu2 %v2125_v5  ;;  %v581_v21 = vadd.f32 %v2826_v30, %v580_v8  ;;  %v2305_v4 = vld [vmem:[%s3354_s6 + $0x18] sm:$0xff] }
 0x213   :  { %1111 = vmatpush.bf16.msrb.mxu0 %v2305_v4  ;;  %v97_v8 = vld [vmem:[%s3349_s1 + $0x38] sm:$0xff]  }
 0x214   :  { %v822_v11 = vpack.c.bf16 %v795_v10, %v794_v9  ;;  %v2304_v9 = vld [vmem:[%s3354_s6 + $0x10] sm:$0xff]  ;;  %v768_v15 = vunpack.c.l.bf16 %v97_v8  ;;  %v769_v17 = vunpack.c.h.bf16 %v97_v8  ;;  %v604_v8 = vadd.f32 %v2826_v30, %v2856_v7 }
 0x215   :  { %v667_v12 = vpop.f32.mrf.mxu2 }
 0x216   :  { %930 = vmatmul.bf16.gmra.mxu3 %v822_v11  ;;  %v668_v16 = vadd.f32 %v667_v12, %v579_v14 }
 0x217   :  { %v2918_v41 = vpop.f32.mrf.mxu3  ;;  %1112 = vmatpush.bf16.msrb.mxu0 %v2304_v9 }
 0x218   :  { %v732_v24 = vmax.f32 %v668_v16, 0.0 }
 0x219   :  { %v583_v20 = vpop.f32.mrf.mxu1 }
 0x21a   :  { %v796_v32 = vadd.f32 %v764_v22, %v732_v24  ;;  %v584_v39 = vadd.f32 %v2826_v30, %v583_v20 }
 0x21b   :  { %1113 = vmatpush.bf16.msrb.mxu0 %v2303_v18 }
 0x21d   :  { %v669_v23 = vpop.f32.mrf.mxu2 }
 0x21e   :  { %v670_v25 = vadd.f32 %v669_v23, %v581_v21  ;;  %v2302_v23 = vld [vmem:[%s3354_s6] sm:$0xff] }
 0x21f   :  { %v2936_v63 = vpop.f32.mrf.mxu3  ;;  %1114 = vmatpush.bf16.msrb.mxu0 %v2302_v23 }
 0x220   :  { %v733_v31 = vmax.f32 %v670_v25, 0.0 }
 0x221   :  { %v585_v38 = vpop.f32.mrf.mxu1 }
 0x222   :  { %v797_v35 = vadd.f32 %v765_v26, %v733_v31  ;;  %711 = vmatmul.bf16.gmra.mxu2 %v2133_v27  ;;  %v586_v48 = vadd.f32 %v2826_v30, %v585_v38  ;;  %v594_v27 = vadd.f32 %v2826_v30, %v2821_v28 }
 0x224   :  { %v823_v36 = vpack.c.bf16 %v797_v35, %v796_v32  ;;  %v99_v32 = vld [vmem:[%s3349_s1 + $0x40] sm:$0xff]   ;;  %v596_v35 = vadd.f32 %v2826_v30, %v2829_v33  ;;  %v101_v33 = vld [vmem:[%s3349_s1 + $0x48] sm:$0xff]  }
 0x225   :  { %v672_v37 = vpop.f32.mrf.mxu2  ;;  %v770_v38 = vunpack.c.l.bf16 %v99_v32  ;;  %v771_v40 = vunpack.c.h.bf16 %v99_v32 }
 0x226   :  { %935 = vmatmul.bf16.gmra.mxu3 %v823_v36  ;;  %v673_v43 = vadd.f32 %v672_v37, %v584_v39 }
 0x227   :  { %v2952_v12 = vpop.f32.mrf.mxu3 }
 0x228   :  { %v734_v52 = vmax.f32 %v673_v43, 0.0 }
 0x229   :  { %v588_v57 = vpop.f32.mrf.mxu1 }
 0x22a   :  { %v798_v60 = vadd.f32 %v766_v49, %v734_v52  ;;  %v589_v3 = vadd.f32 %v2826_v30, %v588_v57  ;;  %v601_v52 = vadd.f32 %v2826_v30, %v2844_v55  ;;  %v772_v57 = vunpack.c.l.bf16 %v101_v33 }
 0x22d   :  { %v674_v51 = vpop.f32.mrf.mxu2 }
 0x22e   :  { %v675_v53 = vadd.f32 %v674_v51, %v586_v48  ;;  %v599_v48 = vadd.f32 %v2826_v30, %v2841_v46 }
 0x22f   :  { %v2960_v26 = vpop.f32.mrf.mxu3 }
 0x230   :  { %v735_v59 = vmax.f32 %v675_v53, 0.0  ;;  %v2981_v53 = vld [vmem:[%s3353_s5] ss:$0 sm:$0xff] }
 0x231   :  { %v590_v5 = vpop.f32.mrf.mxu1 }
 0x232   :  { %v799_v61 = vadd.f32 %v767_v54, %v735_v59  ;;  %716 = vmatmul.bf16.gmra.mxu2 %v2141_v56  ;;  %v591_v10 = vadd.f32 %v2826_v30, %v590_v5  ;;  %v773_v59 = vunpack.c.h.bf16 %v101_v33 }
 0x234   :  { %v824_v1 = vpack.c.bf16 %v799_v61, %v798_v60 }
 0x235   :  { %v677_v2 = vpop.f32.mrf.mxu2 }
 0x236   :  { %940 = vmatmul.bf16.gmra.mxu3 %v824_v1  ;;  %v678_v6 = vadd.f32 %v677_v2, %v589_v3 }
 0x237   :  { %v2969_v43 = vpop.f32.mrf.mxu3 }
 0x238   :  { %v736_v14 = vmax.f32 %v678_v6, 0.0 }
 0x23a   :  { %v800_v21 = vadd.f32 %v768_v15, %v736_v14  ;;  %v606_v14 = vadd.f32 %v2826_v30, %v2869_v19  ;;  %v609_v19 = vadd.f32 %v2826_v30, %v2872_v34 }
 0x23d   :  { %v679_v11 = vpop.f32.mrf.mxu2 }
 0x23e   :  { %v680_v16 = vadd.f32 %v679_v11, %v591_v10  ;;  %v103_v11 = vld [vmem:[%s3349_s1 + $0x50] sm:$0xff]  }
 0x240   :  { %v737_v20 = vmax.f32 %v680_v16, 0.0 }
 0x242   :  { %v801_v22 = vadd.f32 %v769_v17, %v737_v20  ;;  %v774_v17 = vunpack.c.l.bf16 %v103_v11  ;;  %v775_v20 = vunpack.c.h.bf16 %v103_v11 }
 0x244   :  { %v825_v24 = vpack.c.bf16 %v801_v22, %v800_v21 }
 0x245   :  { %v682_v25 = vpop.f32.mrf.mxu2 }
 0x246   :  { %945 = vmatmul.bf16.gmra.mxu3 %v825_v24  ;;  %v683_v31 = vadd.f32 %v682_v25, %v594_v27 }
 0x248   :  { %v738_v37 = vmax.f32 %v683_v31, 0.0 }
 0x24a   :  { %v802_v44 = vadd.f32 %v770_v38, %v738_v37 }
 0x24d   :  { %v684_v36 = vpop.f32.mrf.mxu2 }
 0x24e   :  { %v685_v39 = vadd.f32 %v684_v36, %v596_v35 }
 0x250   :  { %v739_v42 = vmax.f32 %v685_v39, 0.0  ;;  %v105_v39 = vld [vmem:[%s3349_s1 + $0x58] sm:$0xff]  }
 0x252   :  { %v803_v45 = vadd.f32 %v771_v40, %v739_v42  ;;  %v611_v40 = vadd.f32 %v2826_v30, %v2884_v50  ;;  %v614_v50 = vadd.f32 %v2826_v30, %v2896_v62 }
 0x254   :  { %v826_v47 = vpack.c.bf16 %v803_v45, %v802_v44  ;;  %v776_v45 = vunpack.c.l.bf16 %v105_v39 }
 0x255   :  { %v687_v28 = vpop.f32.mrf.mxu2 }
 0x256   :  { %950 = vmatmul.bf16.gmra.mxu3 %v826_v47  ;;  %v688_v51 = vadd.f32 %v687_v28, %v599_v48  ;;  %v777_v28 = vunpack.c.h.bf16 %v105_v39 }
 0x258   :  { %v740_v56 = vmax.f32 %v688_v51, 0.0 }
 0x259   :  { %v911_v49 = vpop.f32.mrf.mxu3 }
 0x25a   :  { %v912_v46 = vadd.f32 %v2981_v53, %v911_v49  ;;  %v804_v0 = vadd.f32 %v772_v57, %v740_v56 }
 0x25c   :  { %v991_v3 = vmax.f32 %v912_v46, 0.0 }
 0x25d   :  { %v689_v54 = vpop.f32.mrf.mxu2 }
 0x25e   :  { %v690_v58 = vadd.f32 %v689_v54, %v601_v52 }
 0x260   :  { %v741_v60 = vmax.f32 %v690_v58, 0.0 }
 0x261   :  { %v913_v61 = vpop.f32.mrf.mxu3 }
 0x262   :  { %v805_v1 = vadd.f32 %v773_v59, %v741_v60  ;;  %v914_v2 = vadd.f32 %v2981_v53, %v913_v61  ;;  %v107_v61 = vld [vmem:[%s3349_s1 + $0x60] sm:$0xff]  }
 0x264   :  { %v992_v55 = vmax.f32 %v914_v2, 0.0  ;;  %v827_v4 = vpack.c.bf16 %v805_v1, %v804_v0  ;;  %v616_v0 = vadd.f32 %v2826_v30, %v2899_v13  ;;  %v619_v13 = vadd.f32 %v2826_v30, %v2912_v29 }
 0x265   :  { %v692_v5 = vpop.f32.mrf.mxu2 }
 0x266   :  { %955 = vmatmul.bf16.gmra.mxu3 %v827_v4  ;;  %v1023_v6 = vpack.c.bf16 %v992_v55, %v991_v3  ;;  %v693_v10 = vadd.f32 %v692_v5, %v604_v8  ;;  %v778_v3 = vunpack.c.l.bf16 %v107_v61  ;;  %v779_v4 = vunpack.c.h.bf16 %v107_v61 }
 0x268   :  { %1115 = vmatmul.bf16.vlgmr.msrb.gmra.mxu0 %v1023_v6  ;;  %v742_v16 = vmax.f32 %v693_v10, 0.0 }
 0x269   :  { %v916_v9 = vpop.f32.mrf.mxu3 }
 0x26a   :  { %v917_v21 = vadd.f32 %v2981_v53, %v916_v9  ;;  %v806_v7 = vadd.f32 %v774_v17, %v742_v16 }
 0x26c   :  { %v993_v27 = vmax.f32 %v917_v21, 0.0  ;;  %v109_v21 = vld [vmem:[%s3349_s1 + $0x68] sm:$0xff]  }
 0x26d   :  { %v694_v15 = vpop.f32.mrf.mxu2 }
 0x26e   :  { %v695_v18 = vadd.f32 %v694_v15, %v606_v14 }
 0x270   :  { %v743_v22 = vmax.f32 %v695_v18, 0.0 }
 0x271   :  { %v918_v23 = vpop.f32.mrf.mxu3 }
 0x272   :  { %v807_v24 = vadd.f32 %v775_v20, %v743_v22  ;;  %v919_v25 = vadd.f32 %v2981_v53, %v918_v23  ;;  %v621_v22 = vadd.f32 %v2826_v30, %v2918_v41  ;;  %v624_v41 = vadd.f32 %v2826_v30, %v2936_v63 }
 0x274   :  { %v994_v31 = vmax.f32 %v919_v25, 0.0  ;;  %v828_v32 = vpack.c.bf16 %v807_v24, %v806_v7  ;;  %v780_v24 = vunpack.c.l.bf16 %v109_v21 }
 0x275   :  { %v697_v35 = vpop.f32.mrf.mxu2 }
 0x276   :  { %960 = vmatmul.bf16.gmra.mxu3 %v828_v32  ;;  %v1024_v36 = vpack.c.bf16 %v994_v31, %v993_v27  ;;  %v698_v38 = vadd.f32 %v697_v35, %v609_v19  ;;  %v781_v27 = vunpack.c.h.bf16 %v109_v21 }
 0x278   :  { %1120 = vmatmul.bf16.gmra.mxu0 %v1024_v36  ;;  %v744_v44 = vmax.f32 %v698_v38, 0.0 }
 0x279   :  { %v921_v37 = vpop.f32.mrf.mxu3 }
 0x27a   :  { %v922_v48 = vadd.f32 %v2981_v53, %v921_v37  ;;  %v808_v34 = vadd.f32 %v776_v45, %v744_v44 }
 0x27c   :  { %v995_v54 = vmax.f32 %v922_v48, 0.0 }
 0x27d   :  { %v699_v42 = vpop.f32.mrf.mxu2 }
 0x27e   :  { %v700_v47 = vadd.f32 %v699_v42, %v611_v40 }
 0x280   :  { %v745_v49 = vmax.f32 %v700_v47, 0.0  ;;  %v111_v47 = vld [vmem:[%s3349_s1 + $0x70] sm:$0xff]  }
 0x281   :  { %v923_v51 = vpop.f32.mrf.mxu3 }
 0x282   :  { %v809_v33 = vadd.f32 %v777_v28, %v745_v49  ;;  %v924_v52 = vadd.f32 %v2981_v53, %v923_v51  ;;  %v626_v28 = vadd.f32 %v2826_v30, %v2952_v12  ;;  %v782_v51 = vunpack.c.l.bf16 %v111_v47 }
 0x284   :  { %v996_v56 = vmax.f32 %v924_v52, 0.0  ;;  %v829_v57 = vpack.c.bf16 %v809_v33, %v808_v34  ;;  %v783_v33 = vunpack.c.h.bf16 %v111_v47 }
 0x285   :  { %v702_v58 = vpop.f32.mrf.mxu2 }
 0x286   :  { %965 = vmatmul.bf16.gmra.mxu3 %v829_v57  ;;  %v1025_v59 = vpack.c.bf16 %v996_v56, %v995_v54  ;;  %v703_v60 = vadd.f32 %v702_v58, %v614_v50 }
 0x288   :  { %1125 = vmatmul.bf16.gmra.mxu0 %v1025_v59  ;;  %v746_v2 = vmax.f32 %v703_v60, 0.0  ;;  %v2317_v59 = vld [vmem:[#allocation2 + $0x38] sm:$0xff] }
 0x289   :  { %v926_v46 = vpop.f32.mrf.mxu3  ;;  %1312 = vmatpush.bf16.msrb.mxu1 %v2317_v59 }
 0x28a   :  { %v927_v5 = vadd.f32 %v2981_v53, %v926_v46  ;;  %v810_v62 = vadd.f32 %v778_v3, %v746_v2 }
 0x28c   :  { %v997_v11 = vmax.f32 %v927_v5, 0.0  ;;  %v631_v5 = vadd.f32 %v2826_v30, %v2969_v43 }
 0x28d   :  { %v704_v1 = vpop.f32.mrf.mxu2 }
 0x28e   :  { %v705_v55 = vadd.f32 %v704_v1, %v616_v0  ;;  %v2316_v0 = vld [vmem:[#allocation2 + $0x30] sm:$0xff]  ;;  %v629_v1 = vadd.f32 %v2826_v30, %v2960_v26 }
 0x28f   :  { %1313 = vmatpush.bf16.msrb.mxu1 %v2316_v0 }
 0x290   :  { %v747_v6 = vmax.f32 %v705_v55, 0.0  ;;  %v113_v55 = vld [vmem:[%s3349_s1 + $0x78] sm:$0xff]  }
 0x291   :  { %v928_v8 = vpop.f32.mrf.mxu3 }
 0x292   :  { %v811_v9 = vadd.f32 %v779_v4, %v747_v6  ;;  %v929_v10 = vadd.f32 %v2981_v53, %v928_v8  ;;  %v2315_v4 = vld [vmem:[#allocation2 + $0x28] sm:$0xff] }
 0x293   :  { %1314 = vmatpush.bf16.msrb.mxu1 %v2315_v4 }
 0x294   :  { %v998_v14 = vmax.f32 %v929_v10, 0.0  ;;  %v830_v15 = vpack.c.bf16 %v811_v9, %v810_v62  ;;  %v784_v62 = vunpack.c.l.bf16 %v113_v55  ;;  %v785_v10 = vunpack.c.h.bf16 %v113_v55 }
 0x295   :  { %v707_v16 = vpop.f32.mrf.mxu2 }
 0x296   :  { %970 = vmatmul.bf16.gmra.mxu3 %v830_v15  ;;  %v1026_v17 = vpack.c.bf16 %v998_v14, %v997_v11  ;;  %v708_v20 = vadd.f32 %v707_v16, %v619_v13  ;;  %v2314_v11 = vld [vmem:[#allocation2 + $0x20] sm:$0xff] }
 0x297   :  { %1315 = vmatpush.bf16.msrb.mxu1 %v2314_v11 }
 0x298   :  { %1130 = vmatmul.bf16.gmra.mxu0 %v1026_v17  ;;  %v748_v7 = vmax.f32 %v708_v20, 0.0 }
 0x299   :  { %v931_v18 = vpop.f32.mrf.mxu3 }
 0x29a   :  { %v932_v31 = vadd.f32 %v2981_v53, %v931_v18  ;;  %v812_v29 = vadd.f32 %v780_v24, %v748_v7  ;;  %v2313_v18 = vld [vmem:[#allocation2 + $0x18] sm:$0xff]  ;;  %v2311_v7 = vld [vmem:[#allocation2 + $0x8] sm:$0xff]  ;;  %v2310_v24 = vld [vmem:[#allocation2] sm:$0xff] }
 0x29b   :  { %1316 = vmatpush.bf16.msrb.mxu1 %v2313_v18 }
 0x29c   :  { %v999_v37 = vmax.f32 %v932_v31, 0.0 }
 0x29d   :  { %v709_v23 = vpop.f32.mrf.mxu2 }
 0x29e   :  { %v710_v25 = vadd.f32 %v709_v23, %v621_v22  ;;  %v2312_v22 = vld [vmem:[#allocation2 + $0x10] sm:$0xff] }
 0x29f   :  { %1317 = vmatpush.bf16.msrb.mxu1 %v2312_v22 }
 0x2a0   :  { %v749_v32 = vmax.f32 %v710_v25, 0.0 }
 0x2a1   :  { %v933_v35 = vpop.f32.mrf.mxu3 }
 0x2a2   :  { %v813_v36 = vadd.f32 %v781_v27, %v749_v32  ;;  %v934_v19 = vadd.f32 %v2981_v53, %v933_v35 }
 0x2a3   :  { %1318 = vmatpush.bf16.msrb.mxu1 %v2311_v7 }
 0x2a4   :  { %v1000_v38 = vmax.f32 %v934_v19, 0.0  ;;  %v831_v39 = vpack.c.bf16 %v813_v36, %v812_v29 }
 0x2a5   :  { %v712_v40 = vpop.f32.mrf.mxu2 }
 0x2a6   :  { %v1027_v42 = vpack.c.bf16 %v1000_v38, %v999_v37  ;;  %975 = vmatmul.bf16.gmra.mxu3 %v831_v39  ;;  %v713_v45 = vadd.f32 %v712_v40, %v624_v41 }
 0x2a7   :  { %1319 = vmatpush.bf16.msrb.mxu1 %v2310_v24 }
 0x2a8   :  { %1135 = vmatmul.bf16.gmra.mxu0 %v1027_v42  ;;  %v750_v49 = vmax.f32 %v713_v45, 0.0 }
 0x2a9   :  { %v936_v44 = vpop.f32.mrf.mxu3 }
 0x2aa   :  { %v937_v52 = vadd.f32 %v2981_v53, %v936_v44  ;;  %v814_v63 = vadd.f32 %v782_v51, %v750_v49  ;;  %v3046_v44 = vld [vmem:[%s3355_s7] ss:$0 sm:$0xff] }
 0x2ac   :  { %v1001_v50 = vmax.f32 %v937_v52, 0.0 }
 0x2ad   :  { %v714_v48 = vpop.f32.mrf.mxu2 }
 0x2ae   :  { %v715_v34 = vadd.f32 %v714_v48, %v626_v28 }
 0x2b0   :  { %v751_v54 = vmax.f32 %v715_v34, 0.0 }
 0x2b1   :  { %v938_v56 = vpop.f32.mrf.mxu3 }
 0x2b2   :  { %v815_v57 = vadd.f32 %v783_v33, %v751_v54  ;;  %v939_v58 = vadd.f32 %v2981_v53, %v938_v56 }
 0x2b4   :  { %v1002_v46 = vmax.f32 %v939_v58, 0.0  ;;  %v832_v60 = vpack.c.bf16 %v815_v57, %v814_v63 }
 0x2b5   :  { %v717_v61 = vpop.f32.mrf.mxu2 }
 0x2b6   :  { %v1028_v12 = vpack.c.bf16 %v1002_v46, %v1001_v50  ;;  %980 = vmatmul.bf16.gmra.mxu3 %v832_v60  ;;  %v718_v3 = vadd.f32 %v717_v61, %v629_v1 }
 0x2b8   :  { %1140 = vmatmul.bf16.gmra.mxu0 %v1028_v12  ;;  %v752_v8 = vmax.f32 %v718_v3, 0.0 }
 0x2b9   :  { %v941_v2 = vpop.f32.mrf.mxu3 }
 0x2ba   :  { %v942_v26 = vadd.f32 %v2981_v53, %v941_v2  ;;  %v816_v16 = vadd.f32 %v784_v62, %v752_v8 }
 0x2bc   :  { %v1003_v20 = vmax.f32 %v942_v26, 0.0 }
 0x2bd   :  { %v719_v6 = vpop.f32.mrf.mxu2 }
 0x2be   :  { %v720_v9 = vadd.f32 %v719_v6, %v631_v5 }
 0x2c0   :  { %v753_v14 = vmax.f32 %v720_v9, 0.0 }
 0x2c1   :  { %v943_v15 = vpop.f32.mrf.mxu3 }
 0x2c2   :  { %v817_v17 = vadd.f32 %v785_v10, %v753_v14  ;;  %v944_v13 = vadd.f32 %v2981_v53, %v943_v15 }
 0x2c4   :  { %v1004_v21 = vmax.f32 %v944_v13, 0.0  ;;  %v833_v30 = vpack.c.bf16 %v817_v17, %v816_v16 }
 0x2c6   :  { %v1029_v43 = vpack.c.bf16 %v1004_v21, %v1003_v20  ;;  %985 = vmatmul.bf16.gmra.mxu3 %v833_v30 }
 0x2c8   :  { %1145 = vmatmul.bf16.gmra.mxu0 %v1029_v43 }
 0x2c9   :  { %v946_v23 = vpop.f32.mrf.mxu3 }
 0x2ca   :  { %v947_v25 = vadd.f32 %v2981_v53, %v946_v23 }
 0x2cc   :  { %v1005_v32 = vmax.f32 %v947_v25, 0.0 }
 0x2d1   :  { %v948_v27 = vpop.f32.mrf.mxu3 }
 0x2d2   :  { %v949_v31 = vadd.f32 %v2981_v53, %v948_v27 }
 0x2d4   :  { %v1006_v35 = vmax.f32 %v949_v31, 0.0 }
 0x2d6   :  { %v1030_v29 = vpack.c.bf16 %v1006_v35, %v1005_v32 }
 0x2d8   :  { %1150 = vmatmul.bf16.gmra.mxu0 %v1030_v29 }
 0x2d9   :  { %v951_v36 = vpop.f32.mrf.mxu3 }
 0x2da   :  { %v952_v19 = vadd.f32 %v2981_v53, %v951_v36 }
 0x2dc   :  { %v1007_v39 = vmax.f32 %v952_v19, 0.0 }
 0x2e1   :  { %v953_v37 = vpop.f32.mrf.mxu3 }
 0x2e2   :  { %v954_v38 = vadd.f32 %v2981_v53, %v953_v37 }
 0x2e4   :  { %v1008_v40 = vmax.f32 %v954_v38, 0.0 }
 0x2e5   :  { %v1116_v42 = vpop.f32.mrf.mxu0 }
 0x2e6   :  { %v1031_v41 = vpack.c.bf16 %v1008_v40, %v1007_v39  ;;  %v1117_v47 = vadd.f32 %v3046_v44, %v1116_v42 }
 0x2e8   :  { %1155 = vmatmul.bf16.gmra.mxu0 %v1031_v41  ;;  %v1196_v49 = vmax.f32 %v1117_v47, 0.0 }
 0x2e9   :  { %v956_v45 = vpop.f32.mrf.mxu3 }
 0x2ea   :  { %v957_v51 = vadd.f32 %v2981_v53, %v956_v45 }
 0x2ec   :  { %v1009_v56 = vmax.f32 %v957_v51, 0.0 }
 0x2ed   :  { %v1118_v28 = vpop.f32.mrf.mxu0 }
 0x2ee   :  { %v1119_v48 = vadd.f32 %v3046_v44, %v1118_v28 }
 0x2f0   :  { %v1197_v34 = vmax.f32 %v1119_v48, 0.0 }
 0x2f1   :  { %v958_v33 = vpop.f32.mrf.mxu3 }
 0x2f2   :  { %v959_v52 = vadd.f32 %v2981_v53, %v958_v33  ;;  %v1228_v54 = vpack.c.bf16 %v1197_v34, %v1196_v49 }
 0x2f4   :  { %v1010_v63 = vmax.f32 %v959_v52, 0.0  ;;  %1320 = vmatmul.bf16.vlgmr.msrb.gmra.mxu1 %v1228_v54 }
 0x2f5   :  { %v1121_v57 = vpop.f32.mrf.mxu0 }
 0x2f6   :  { %v1032_v58 = vpack.c.bf16 %v1010_v63, %v1009_v56  ;;  %v1122_v50 = vadd.f32 %v3046_v44, %v1121_v57 }
 0x2f8   :  { %1160 = vmatmul.bf16.gmra.mxu0 %v1032_v58  ;;  %v1198_v61 = vmax.f32 %v1122_v50, 0.0 }
 0x2f9   :  { %v961_v59 = vpop.f32.mrf.mxu3 }
 0x2fa   :  { %v962_v12 = vadd.f32 %v2981_v53, %v961_v59 }
 0x2fc   :  { %v1011_v55 = vmax.f32 %v962_v12, 0.0 }
 0x2fd   :  { %v1123_v46 = vpop.f32.mrf.mxu0 }
 0x2fe   :  { %v1124_v60 = vadd.f32 %v3046_v44, %v1123_v46 }
 0x300   :  { %v1199_v0 = vmax.f32 %v1124_v60, 0.0 }
 0x301   :  { %v963_v1 = vpop.f32.mrf.mxu3 }
 0x302   :  { %v964_v2 = vadd.f32 %v2981_v53, %v963_v1  ;;  %v1229_v3 = vpack.c.bf16 %v1199_v0, %v1198_v61 }
 0x304   :  { %v1012_v4 = vmax.f32 %v964_v2, 0.0  ;;  %1325 = vmatmul.bf16.gmra.mxu1 %v1229_v3 }
 0x305   :  { %v1126_v5 = vpop.f32.mrf.mxu0 }
 0x306   :  { %v1033_v6 = vpack.c.bf16 %v1012_v4, %v1011_v55  ;;  %v1127_v62 = vadd.f32 %v3046_v44, %v1126_v5 }
 0x308   :  { %1165 = vmatmul.bf16.gmra.mxu0 %v1033_v6  ;;  %v1200_v11 = vmax.f32 %v1127_v62, 0.0 }
 0x309   :  { %v966_v8 = vpop.f32.mrf.mxu3 }
 0x30a   :  { %v967_v26 = vadd.f32 %v2981_v53, %v966_v8 }
 0x30c   :  { %v1013_v13 = vmax.f32 %v967_v26, 0.0 }
 0x30d   :  { %v1128_v9 = vpop.f32.mrf.mxu0 }
 0x30e   :  { %v1129_v10 = vadd.f32 %v3046_v44, %v1128_v9 }
 0x310   :  { %v1201_v14 = vmax.f32 %v1129_v10, 0.0 }
 0x311   :  { %v968_v15 = vpop.f32.mrf.mxu3 }
 0x312   :  { %v969_v16 = vadd.f32 %v2981_v53, %v968_v15  ;;  %v1230_v17 = vpack.c.bf16 %v1201_v14, %v1200_v11 }
 0x314   :  { %v1014_v18 = vmax.f32 %v969_v16, 0.0  ;;  %1330 = vmatmul.bf16.gmra.mxu1 %v1230_v17 }
 0x315   :  { %v1131_v20 = vpop.f32.mrf.mxu0 }
 0x316   :  { %v1034_v21 = vpack.c.bf16 %v1014_v18, %v1013_v13  ;;  %v1132_v43 = vadd.f32 %v3046_v44, %v1131_v20 }
 0x318   :  { %1170 = vmatmul.bf16.gmra.mxu0 %v1034_v21  ;;  %v1202_v7 = vmax.f32 %v1132_v43, 0.0 }
 0x319   :  { %v971_v30 = vpop.f32.mrf.mxu3 }
 0x31a   :  { %v972_v24 = vadd.f32 %v2981_v53, %v971_v30 }
 0x31c   :  { %v1015_v35 = vmax.f32 %v972_v24, 0.0 }
 0x31d   :  { %v1133_v22 = vpop.f32.mrf.mxu0 }
 0x31e   :  { %v1134_v23 = vadd.f32 %v3046_v44, %v1133_v22 }
 0x320   :  { %v1203_v25 = vmax.f32 %v1134_v23, 0.0  ;;  %v3083_v23 = vld [vmem:[%s3357_s9] ss:$0 sm:$0xff] }
 0x321   :  { %v973_v27 = vpop.f32.mrf.mxu3 }
 0x322   :  { %v974_v31 = vadd.f32 %v2981_v53, %v973_v27  ;;  %v1231_v32 = vpack.c.bf16 %v1203_v25, %v1202_v7 }
 0x324   :  { %v1016_v29 = vmax.f32 %v974_v31, 0.0  ;;  %1335 = vmatmul.bf16.gmra.mxu1 %v1231_v32 }
 0x325   :  { %v1136_v36 = vpop.f32.mrf.mxu0 }
 0x326   :  { %v1035_v19 = vpack.c.bf16 %v1016_v29, %v1015_v35  ;;  %v1137_v38 = vadd.f32 %v3046_v44, %v1136_v36 }
 0x328   :  { %1175 = vmatmul.bf16.gmra.mxu0 %v1035_v19  ;;  %v1204_v42 = vmax.f32 %v1137_v38, 0.0 }
 0x329   :  { %v976_v37 = vpop.f32.mrf.mxu3 }
 0x32a   :  { %v977_v41 = vadd.f32 %v2981_v53, %v976_v37 }
 0x32c   :  { %v1017_v49 = vmax.f32 %v977_v41, 0.0 }
 0x32d   :  { %v1138_v39 = vpop.f32.mrf.mxu0 }
 0x32e   :  { %v1139_v40 = vadd.f32 %v3046_v44, %v1138_v39 }
 0x330   :  { %v1205_v45 = vmax.f32 %v1139_v40, 0.0 }
 0x331   :  { %v978_v47 = vpop.f32.mrf.mxu3 }
 0x332   :  { %v1232_v28 = vpack.c.bf16 %v1205_v45, %v1204_v42  ;;  %v979_v48 = vadd.f32 %v2981_v53, %v978_v47 }
 0x334   :  { %v1018_v51 = vmax.f32 %v979_v48, 0.0  ;;  %1340 = vmatmul.bf16.gmra.mxu1 %v1232_v28 }
 0x335   :  { %v1141_v34 = vpop.f32.mrf.mxu0 }
 0x336   :  { %v1036_v33 = vpack.c.bf16 %v1018_v51, %v1017_v49  ;;  %v1142_v54 = vadd.f32 %v3046_v44, %v1141_v34 }
 0x338   :  { %1180 = vmatmul.bf16.gmra.mxu0 %v1036_v33  ;;  %v1206_v57 = vmax.f32 %v1142_v54, 0.0 }
 0x339   :  { %v981_v52 = vpop.f32.mrf.mxu3 }
 0x33a   :  { %v982_v58 = vadd.f32 %v2981_v53, %v981_v52 }
 0x33c   :  { %v1019_v61 = vmax.f32 %v982_v58, 0.0 }
 0x33d   :  { %v1143_v56 = vpop.f32.mrf.mxu0 }
 0x33e   :  { %v1144_v63 = vadd.f32 %v3046_v44, %v1143_v56 }
 0x340   :  { %v1207_v59 = vmax.f32 %v1144_v63, 0.0 }
 0x341   :  { %v983_v50 = vpop.f32.mrf.mxu3 }
 0x342   :  { %v1233_v46 = vpack.c.bf16 %v1207_v59, %v1206_v57  ;;  %v984_v60 = vadd.f32 %v2981_v53, %v983_v50 }
 0x344   :  { %v1020_v12 = vmax.f32 %v984_v60, 0.0  ;;  %1345 = vmatmul.bf16.gmra.mxu1 %v1233_v46 }
 0x345   :  { %v1146_v0 = vpop.f32.mrf.mxu0 }
 0x346   :  { %v1037_v1 = vpack.c.bf16 %v1020_v12, %v1019_v61  ;;  %v1147_v3 = vadd.f32 %v3046_v44, %v1146_v0 }
 0x348   :  { %1185 = vmatmul.bf16.gmra.mxu0 %v1037_v1  ;;  %v1208_v5 = vmax.f32 %v1147_v3, 0.0 }
 0x349   :  { %v986_v2 = vpop.f32.mrf.mxu3 }
 0x34a   :  { %v987_v6 = vadd.f32 %v2981_v53, %v986_v2 }
 0x34c   :  { %v1021_v11 = vmax.f32 %v987_v6, 0.0 }
 0x34d   :  { %v1148_v55 = vpop.f32.mrf.mxu0 }
 0x34e   :  { %v1149_v4 = vadd.f32 %v3046_v44, %v1148_v55 }
 0x350   :  { %v1209_v8 = vmax.f32 %v1149_v4, 0.0 }
 0x351   :  { %v988_v62 = vpop.f32.mrf.mxu3 }
 0x352   :  { %v1234_v9 = vpack.c.bf16 %v1209_v8, %v1208_v5  ;;  %v989_v10 = vadd.f32 %v2981_v53, %v988_v62 }
 0x354   :  { %v1022_v26 = vmax.f32 %v989_v10, 0.0  ;;  %1350 = vmatmul.bf16.gmra.mxu1 %v1234_v9 }
 0x355   :  { %v1151_v14 = vpop.f32.mrf.mxu0 }
 0x356   :  { %v1038_v15 = vpack.c.bf16 %v1022_v26, %v1021_v11  ;;  %v1152_v16 = vadd.f32 %v3046_v44, %v1151_v14 }
 0x358   :  { %1190 = vmatmul.bf16.gmra.mxu0 %v1038_v15  ;;  %v1210_v18 = vmax.f32 %v1152_v16, 0.0 }
 0x35d   :  { %v1153_v17 = vpop.f32.mrf.mxu0 }
 0x35e   :  { %v1154_v13 = vadd.f32 %v3046_v44, %v1153_v17 }
 0x360   :  { %v1211_v20 = vmax.f32 %v1154_v13, 0.0 }
 0x362   :  { %v1235_v21 = vpack.c.bf16 %v1211_v20, %v1210_v18 }
 0x364   :  { %1355 = vmatmul.bf16.gmra.mxu1 %v1235_v21 }
 0x365   :  { %v1156_v30 = vpop.f32.mrf.mxu0 }
 0x366   :  { %v1157_v43 = vadd.f32 %v3046_v44, %v1156_v30 }
 0x368   :  { %v1212_v7 = vmax.f32 %v1157_v43, 0.0 }
 0x36d   :  { %v1158_v22 = vpop.f32.mrf.mxu0 }
 0x36e   :  { %v1159_v53 = vadd.f32 %v3046_v44, %v1158_v22 }
 0x370   :  { %v1213_v24 = vmax.f32 %v1159_v53, 0.0 }
 0x371   :  { %v1321_v25 = vpop.f32.mrf.mxu1 }
 0x372   :  { %v1236_v27 = vpack.c.bf16 %v1213_v24, %v1212_v7  ;;  %v1322_v31 = vadd.f32 %v3083_v23, %v1321_v25 }
 0x374   :  { %v1433_v32 = vand.u32 2147483647, %v1322_v31  ;;  %1360 = vmatmul.bf16.gmra.mxu1 %v1236_v27  ;;  %v1401_v3 = vmax.f32 %v1322_v31, 0.0 }
 0x375   :  { %v1161_v35 = vpop.f32.mrf.mxu0 }
 0x376   :  { %v1465_v29 = vsub.f32 0.0, %v1433_v32  ;;  %v1162_v38 = vadd.f32 %v3046_v44, %v1161_v35 }
 0x378   :  { %v1497_v36 = vmul.f32 1.442695, %v1465_v29  ;;  %v1214_v47 = vmax.f32 %v1162_v38, 0.0 }
 0x379   :  { %v1323_v19 = vpop.f32.mrf.mxu1 }
 0x37a   :  { %2341 = vpow2.f32 %v1497_v36  ;;  %v3087_v37 = vadd.f32 %v3083_v23, %v1323_v19 }
 0x37c   :  { %v1434_v39 = vand.u32 2147483647, %v3087_v37  ;;  %v1402_v53 = vmax.f32 %v3087_v37, 0.0 }
 0x37d   :  { %v1163_v40 = vpop.f32.mrf.mxu0 }
 0x37e   :  { %v1466_v42 = vsub.f32 0.0, %v1434_v39  ;;  %v1164_v41 = vadd.f32 %v3046_v44, %v1163_v40 }
 0x380   :  { %v2342_v45 = vpop.eup %2341  ;;  %v1499_v28 = vmul.f32 1.442695, %v1466_v42  ;;  %v1215_v48 = vmax.f32 %v1164_v41, 0.0 }
 0x381   :  { %v1561_v49 = vadd.f32 1.0, %v2342_v45  ;;  %v1326_v51 = vpop.f32.mrf.mxu1  ;;  %v1564_v34 = vmul.f32 -0.5, %v2342_v45  ;;  %v1567_v58 = vand.u32 2147483647, %v2342_v45 }
 0x382   :  { %2343 = vpow2.f32 %v1499_v28  ;;  %v1237_v33 = vpack.c.bf16 %v1215_v48, %v1214_v47  ;;  %v3093_v52 = vadd.f32 %v3083_v23, %v1326_v51 }
 0x383   :  { %2345 = vlog2.f32 %v1561_v49  ;;  %v1565_v63 = vadd.f32 1.0, %v1564_v34  ;;  %vm1568_vm0 = vcmp.lt.f32.partialorder %v1567_v58, 0.0004427343 }
 0x384   :  { %v1435_v54 = vand.u32 2147483647, %v3093_v52  ;;  %1365 = vmatmul.bf16.gmra.mxu1 %v1237_v33 }
 0x385   :  { %v1166_v56 = vpop.f32.mrf.mxu0  ;;  %v1566_v1 = vmul.f32 %v2342_v45, %v1565_v63  ;;  %v1403_v45 = vmax.f32 %v3093_v52, 0.0 }
 0x386   :  { %v1467_v57 = vsub.f32 0.0, %v1435_v54  ;;  %v1167_v4 = vadd.f32 %v3046_v44, %v1166_v56 }
 0x388   :  { %v2344_v59 = vpop.eup %2343  ;;  %v1501_v50 = vmul.f32 1.442695, %v1467_v57  ;;  %v1216_v14 = vmax.f32 %v1167_v4, 0.0 }
 0x389   :  { %v2346_v46 = vpop.eup %2345  ;;  %v1570_v60 = vadd.f32 1.0, %v2344_v59  ;;  %v1573_v61 = vmul.f32 -0.5, %v2344_v59  ;;  %v1328_v12 = vpop.f32.mrf.mxu1  ;;  %v1576_v11 = vand.u32 2147483647, %v2344_v59 }
 0x38a   :  { %v1563_v0 = vmul.f32 0.6931472, %v2346_v46  ;;  %2347 = vpow2.f32 %v1501_v50  ;;  %v3097_v2 = vadd.f32 %v3083_v23, %v1328_v12 }
 0x38b   :  { %2349 = vlog2.f32 %v1570_v60  ;;  %v1574_v8 = vadd.f32 1.0, %v1573_v61  ;;  %vm1577_vm1 = vcmp.lt.f32.partialorder %v1576_v11, 0.0004427343 }
 0x38c   :  { %v1569_v55 = vsel %vm1568_vm0, %v1566_v1, %v1563_v0  ;;  %v1436_v5 = vand.u32 2147483647, %v3097_v2 }
 0x38d   :  { %v1849_v6 = vadd.f32 %v1569_v55, %v1401_v3  ;;  %v1168_v62 = vpop.f32.mrf.mxu0  ;;  %v1575_v13 = vmul.f32 %v2344_v59, %v1574_v8  ;;  %v1404_v3 = vmax.f32 %v3097_v2, 0.0 }
 0x38e   :  { %v1468_v9 = vsub.f32 0.0, %v1436_v5  ;;  %v1169_v10 = vadd.f32 %v3046_v44, %v1168_v62 }
 0x38f   :  { %1881 = vst [vmem:[%s3358_s10] sm:$0xff] %v1849_v6 }
 0x390   :  { %v2348_v26 = vpop.eup %2347  ;;  %v1503_v15 = vmul.f32 1.442695, %v1468_v9  ;;  %v1217_v16 = vmax.f32 %v1169_v10, 0.0 }
 0x391   :  { %v2350_v17 = vpop.eup %2349  ;;  %v1579_v18 = vadd.f32 1.0, %v2348_v26  ;;  %v1582_v20 = vmul.f32 -0.5, %v2348_v26  ;;  %v1331_v21 = vpop.f32.mrf.mxu1  ;;  %v1585_v35 = vand.u32 2147483647, %v2348_v26 }
 0x392   :  { %v1572_v30 = vmul.f32 0.6931472, %v2350_v17  ;;  %2351 = vpow2.f32 %v1503_v15  ;;  %v1238_v43 = vpack.c.bf16 %v1217_v16, %v1216_v14  ;;  %v3106_v22 = vadd.f32 %v3083_v23, %v1331_v21 }
 0x393   :  { %2353 = vlog2.f32 %v1579_v18  ;;  %v1583_v31 = vadd.f32 1.0, %v1582_v20  ;;  %vm1586_vm2 = vcmp.lt.f32.partialorder %v1585_v35, 0.0004427343 }
 0x394   :  { %v1578_v7 = vsel %vm1577_vm1, %v1575_v13, %v1572_v30  ;;  %v1437_v24 = vand.u32 2147483647, %v3106_v22  ;;  %1370 = vmatmul.bf16.gmra.mxu1 %v1238_v43  ;;  %v1405_v18 = vmax.f32 %v3106_v22, 0.0 }
 0x395   :  { %v1850_v25 = vadd.f32 %v1578_v7, %v1402_v53  ;;  %v1171_v27 = vpop.f32.mrf.mxu0  ;;  %v1584_v42 = vmul.f32 %v2348_v26, %v1583_v31 }
 0x396   :  { %v1469_v32 = vsub.f32 0.0, %v1437_v24  ;;  %v1172_v28 = vadd.f32 %v3046_v44, %v1171_v27 }
 0x397   :  { %1882 = vst [vmem:[%s3358_s10 + $0x8] sm:$0xff] %v1850_v25 }
 0x398   :  { %v2352_v29 = vpop.eup %2351  ;;  %v1505_v36 = vmul.f32 1.442695, %v1469_v32  ;;  %v1218_v52 = vmax.f32 %v1172_v28, 0.0 }
 0x399   :  { %v2354_v19 = vpop.eup %2353  ;;  %v1588_v38 = vadd.f32 1.0, %v2352_v29  ;;  %v1591_v37 = vmul.f32 -0.5, %v2352_v29  ;;  %v1333_v39 = vpop.f32.mrf.mxu1  ;;  %v1594_v56 = vand.u32 2147483647, %v2352_v29 }
 0x39a   :  { %v1581_v40 = vmul.f32 0.6931472, %v2354_v19  ;;  %2355 = vpow2.f32 %v1505_v36  ;;  %v3114_v41 = vadd.f32 %v3083_v23, %v1333_v39 }
 0x39b   :  { %2357 = vlog2.f32 %v1588_v38  ;;  %v1592_v51 = vadd.f32 1.0, %v1591_v37  ;;  %vm1595_vm3 = vcmp.lt.f32.partialorder %v1594_v56, 0.0004427343 }
 0x39c   :  { %v1587_v47 = vsel %vm1586_vm2, %v1584_v42, %v1581_v40  ;;  %v1438_v48 = vand.u32 2147483647, %v3114_v41 }
 0x39d   :  { %v1851_v49 = vadd.f32 %v1587_v47, %v1403_v45  ;;  %v1173_v34 = vpop.f32.mrf.mxu0  ;;  %v1593_v50 = vmul.f32 %v2352_v29, %v1592_v51  ;;  %v1406_v45 = vmax.f32 %v3114_v41, 0.0 }
 0x39e   :  { %v1470_v33 = vsub.f32 0.0, %v1438_v48  ;;  %v1174_v54 = vadd.f32 %v3046_v44, %v1173_v34 }
 0x39f   :  { %1883 = vst [vmem:[%s3358_s10 + $0x10] sm:$0xff] %v1851_v49 }
 0x3a0   :  { %v2356_v63 = vpop.eup %2355  ;;  %v1507_v57 = vmul.f32 1.442695, %v1470_v33  ;;  %v1219_v58 = vmax.f32 %v1174_v54, 0.0 }
 0x3a1   :  { %v2358_v59 = vpop.eup %2357  ;;  %v1597_v46 = vadd.f32 1.0, %v2356_v63  ;;  %v1600_v60 = vmul.f32 -0.5, %v2356_v63  ;;  %v1336_v61 = vpop.f32.mrf.mxu1  ;;  %v1603_v9 = vand.u32 2147483647, %v2356_v63 }
 0x3a2   :  { %v1590_v12 = vmul.f32 0.6931472, %v2358_v59  ;;  %2359 = vpow2.f32 %v1507_v57  ;;  %v1239_v0 = vpack.c.bf16 %v1219_v58, %v1218_v52  ;;  %v3124_v1 = vadd.f32 %v3083_v23, %v1336_v61 }
 0x3a3   :  { %2361 = vlog2.f32 %v1597_v46  ;;  %v1601_v8 = vadd.f32 1.0, %v1600_v60  ;;  %vm1604_vm4 = vcmp.lt.f32.partialorder %v1603_v9, 0.0004427343 }
 0x3a4   :  { %v1596_v55 = vsel %vm1595_vm3, %v1593_v50, %v1590_v12  ;;  %v1439_v4 = vand.u32 2147483647, %v3124_v1  ;;  %1375 = vmatmul.bf16.gmra.mxu1 %v1239_v0  ;;  %v1407_v46 = vmax.f32 %v3124_v1, 0.0 }
 0x3a5   :  { %v1852_v5 = vadd.f32 %v1596_v55, %v1404_v3  ;;  %v1176_v6 = vpop.f32.mrf.mxu0  ;;  %v1602_v17 = vmul.f32 %v2356_v63, %v1601_v8 }
 0x3a6   :  { %v1471_v62 = vsub.f32 0.0, %v1439_v4  ;;  %v1177_v21 = vadd.f32 %v3046_v44, %v1176_v6 }
 0x3a7   :  { %1884 = vst [vmem:[%s3358_s10 + $0x18] sm:$0xff] %v1852_v5 }
 0x3a8   :  { %v2360_v10 = vpop.eup %2359  ;;  %v1509_v11 = vmul.f32 1.442695, %v1471_v62  ;;  %v1220_v22 = vmax.f32 %v1177_v21, 0.0 }
 0x3a9   :  { %v2362_v26 = vpop.eup %2361  ;;  %v1606_v14 = vadd.f32 1.0, %v2360_v10  ;;  %v1609_v2 = vmul.f32 -0.5, %v2360_v10  ;;  %v1338_v15 = vpop.f32.mrf.mxu1  ;;  %v1612_v27 = vand.u32 2147483647, %v2360_v10 }
 0x3aa   :  { %v1599_v16 = vmul.f32 0.6931472, %v2362_v26  ;;  %2363 = vpow2.f32 %v1509_v11  ;;  %v3132_v13 = vadd.f32 %v3083_v23, %v1338_v15 }
 0x3ab   :  { %2365 = vlog2.f32 %v1606_v14  ;;  %v1610_v53 = vadd.f32 1.0, %v1609_v2  ;;  %vm1613_vm5 = vcmp.lt.f32.partialorder %v1612_v27, 0.0004427343 }
 0x3ac   :  { %v1605_v20 = vsel %vm1604_vm4, %v1602_v17, %v1599_v16  ;;  %v1440_v30 = vand.u32 2147483647, %v3132_v13 }
 0x3ad   :  { %v1853_v43 = vadd.f32 %v1605_v20, %v1405_v18  ;;  %v1178_v7 = vpop.f32.mrf.mxu0  ;;  %v1611_v36 = vmul.f32 %v2360_v10, %v1610_v53  ;;  %v1408_v18 = vmax.f32 %v3132_v13, 0.0 }
 0x3ae   :  { %v1472_v24 = vsub.f32 0.0, %v1440_v30  ;;  %v1179_v25 = vadd.f32 %v3046_v44, %v1178_v7 }
 0x3af   :  { %1885 = vst [vmem:[%s3358_s10 + $0x20] sm:$0xff] %v1853_v43 }
 0x3b0   :  { %v2364_v31 = vpop.eup %2363  ;;  %v1511_v32 = vmul.f32 1.442695, %v1472_v24  ;;  %v1221_v35 = vmax.f32 %v1179_v25, 0.0 }
 0x3b1   :  { %v2366_v29 = vpop.eup %2365  ;;  %v1615_v19 = vadd.f32 1.0, %v2364_v31  ;;  %v1618_v38 = vmul.f32 -0.5, %v2364_v31  ;;  %v1341_v37 = vpop.f32.mrf.mxu1  ;;  %v1621_v33 = vand.u32 2147483647, %v2364_v31 }
 0x3b2   :  { %v1608_v39 = vmul.f32 0.6931472, %v2366_v29  ;;  %2367 = vpow2.f32 %v1511_v32  ;;  %v1240_v40 = vpack.c.bf16 %v1221_v35, %v1220_v22  ;;  %v3142_v42 = vadd.f32 %v3083_v23, %v1341_v37 }
 0x3b3   :  { %2369 = vlog2.f32 %v1615_v19  ;;  %v1619_v51 = vadd.f32 1.0, %v1618_v38  ;;  %vm1622_vm6 = vcmp.lt.f32.partialorder %v1621_v33, 0.0004427343 }
 0x3b4   :  { %v1614_v47 = vsel %vm1613_vm5, %v1611_v36, %v1608_v39  ;;  %v1441_v28 = vand.u32 2147483647, %v3142_v42  ;;  %1380 = vmatmul.bf16.gmra.mxu1 %v1240_v40  ;;  %v1409_v19 = vmax.f32 %v3142_v42, 0.0 }
 0x3b5   :  { %v1854_v48 = vadd.f32 %v1614_v47, %v1406_v45  ;;  %v1181_v49 = vpop.f32.mrf.mxu0  ;;  %v1620_v59 = vmul.f32 %v2364_v31, %v1619_v51 }
 0x3b6   :  { %v1473_v34 = vsub.f32 0.0, %v1441_v28  ;;  %v1182_v61 = vadd.f32 %v3046_v44, %v1181_v49 }
 0x3b7   :  { %1886 = vst [vmem:[%s3358_s10 + $0x28] sm:$0xff] %v1854_v48 }
 0x3b8   :  { %v2368_v54 = vpop.eup %2367  ;;  %v1513_v56 = vmul.f32 1.442695, %v1473_v34  ;;  %v1222_v1 = vmax.f32 %v1182_v61, 0.0 }
 0x3b9   :  { %v2370_v63 = vpop.eup %2369  ;;  %v1624_v52 = vadd.f32 1.0, %v2368_v54  ;;  %v1627_v41 = vmul.f32 -0.5, %v2368_v54  ;;  %v1343_v57 = vpop.f32.mrf.mxu1  ;;  %v1630_v6 = vand.u32 2147483647, %v2368_v54 }
 0x3ba   :  { %v1617_v58 = vmul.f32 0.6931472, %v2370_v63  ;;  %2371 = vpow2.f32 %v1513_v56  ;;  %v3150_v50 = vadd.f32 %v3083_v23, %v1343_v57 }
 0x3bb   :  { %2373 = vlog2.f32 %v1624_v52  ;;  %v1628_v3 = vadd.f32 1.0, %v1627_v41  ;;  %vm1631_vm7 = vcmp.lt.f32.partialorder %v1630_v6, 0.0004427343 }
 0x3bc   :  { %v1623_v60 = vsel %vm1622_vm6, %v1620_v59, %v1617_v58  ;;  %v1442_v12 = vand.u32 2147483647, %v3150_v50 }
 0x3bd   :  { %v1855_v0 = vadd.f32 %v1623_v60, %v1407_v46  ;;  %v1183_v55 = vpop.f32.mrf.mxu0  ;;  %v1629_v11 = vmul.f32 %v2368_v54, %v1628_v3  ;;  %v1410_v46 = vmax.f32 %v3150_v50, 0.0 }
 0x3be   :  { %v1474_v4 = vsub.f32 0.0, %v1442_v12  ;;  %v1184_v5 = vadd.f32 %v3046_v44, %v1183_v55 }
 0x3bf   :  { %1887 = vst [vmem:[%s3358_s10 + $0x30] sm:$0xff] %v1855_v0 }
 0x3c0   :  { %v2372_v8 = vpop.eup %2371  ;;  %v1515_v62 = vmul.f32 1.442695, %v1474_v4  ;;  %v1223_v9 = vmax.f32 %v1184_v5, 0.0 }
 0x3c1   :  { %v2374_v10 = vpop.eup %2373  ;;  %v1633_v26 = vadd.f32 1.0, %v2372_v8  ;;  %v1636_v14 = vmul.f32 -0.5, %v2372_v8  ;;  %v1346_v2 = vpop.f32.mrf.mxu1  ;;  %v1639_v24 = vand.u32 2147483647, %v2372_v8 }
 0x3c2   :  { %v1626_v15 = vmul.f32 0.6931472, %v2374_v10  ;;  %2375 = vpow2.f32 %v1515_v62  ;;  %v1241_v16 = vpack.c.bf16 %v1223_v9, %v1222_v1  ;;  %v3160_v17 = vadd.f32 %v3083_v23, %v1346_v2 }
 0x3c3   :  { %2377 = vlog2.f32 %v1633_v26  ;;  %v1637_v53 = vadd.f32 1.0, %v1636_v14  ;;  %vm1640_vm8 = vcmp.lt.f32.partialorder %v1639_v24, 0.0004427343 }
 0x3c4   :  { %v1632_v20 = vsel %vm1631_vm7, %v1629_v11, %v1626_v15  ;;  %v1443_v21 = vand.u32 2147483647, %v3160_v17  ;;  %1385 = vmatmul.bf16.gmra.mxu1 %v1241_v16  ;;  %v1411_v26 = vmax.f32 %v3160_v17, 0.0 }
 0x3c5   :  { %v1856_v30 = vadd.f32 %v1632_v20, %v1408_v18  ;;  %v1186_v43 = vpop.f32.mrf.mxu0  ;;  %v1638_v29 = vmul.f32 %v2372_v8, %v1637_v53 }
 0x3c6   :  { %v1475_v7 = vsub.f32 0.0, %v1443_v21  ;;  %v1187_v37 = vadd.f32 %v3046_v44, %v1186_v43 }
 0x3c7   :  { %1888 = vst [vmem:[%s3358_s10 + $0x38] sm:$0xff] %v1856_v30 }
 0x3c8   :  { %v2376_v25 = vpop.eup %2375  ;;  %v1517_v27 = vmul.f32 1.442695, %v1475_v7  ;;  %v1224_v42 = vmax.f32 %v1187_v37, 0.0 }
 0x3c9   :  { %v2378_v31 = vpop.eup %2377  ;;  %v1642_v22 = vadd.f32 1.0, %v2376_v25  ;;  %v1645_v13 = vmul.f32 -0.5, %v2376_v25  ;;  %v1348_v32 = vpop.f32.mrf.mxu1  ;;  %v1648_v49 = vand.u32 2147483647, %v2376_v25 }
 0x3ca   :  { %v1635_v35 = vmul.f32 0.6931472, %v2378_v31  ;;  %2379 = vpow2.f32 %v1517_v27  ;;  %v3168_v36 = vadd.f32 %v3083_v23, %v1348_v32 }
 0x3cb   :  { %2381 = vlog2.f32 %v1642_v22  ;;  %v1646_v45 = vadd.f32 1.0, %v1645_v13  ;;  %vm1649_vm9 = vcmp.lt.f32.partialorder %v1648_v49, 0.0004427343 }
 0x3cc   :  { %v1641_v38 = vsel %vm1640_vm8, %v1638_v29, %v1635_v35  ;;  %v1444_v39 = vand.u32 2147483647, %v3168_v36 }
 0x3cd   :  { %v1857_v40 = vadd.f32 %v1641_v38, %v1409_v19  ;;  %v1188_v47 = vpop.f32.mrf.mxu0  ;;  %v1647_v56 = vmul.f32 %v2376_v25, %v1646_v45 }
 0x3ce   :  { %v1476_v28 = vsub.f32 0.0, %v1444_v39  ;;  %v1189_v48 = vadd.f32 %v3046_v44, %v1188_v47 }
 0x3cf   :  { %1889 = vst [vmem:[%s3358_s10 + $0x40] sm:$0xff] %v1857_v40 }
 0x3d0   :  { %v2380_v51 = vpop.eup %2379  ;;  %v1519_v34 = vmul.f32 1.442695, %v1476_v28  ;;  %v1225_v33 = vmax.f32 %v1189_v48, 0.0 }
 0x3d1   :  { %v2382_v54 = vpop.eup %2381  ;;  %v1651_v63 = vadd.f32 1.0, %v2380_v51  ;;  %v1654_v52 = vmul.f32 -0.5, %v2380_v51  ;;  %v1351_v41 = vpop.f32.mrf.mxu1  ;;  %v1657_v4 = vand.u32 2147483647, %v2380_v51 }
 0x3d2   :  { %v1644_v57 = vmul.f32 0.6931472, %v2382_v54  ;;  %2383 = vpow2.f32 %v1519_v34  ;;  %v1242_v58 = vpack.c.bf16 %v1225_v33, %v1224_v42  ;;  %v3178_v59 = vadd.f32 %v3083_v23, %v1351_v41 }
 0x3d3   :  { %2385 = vlog2.f32 %v1651_v63  ;;  %v1655_v3 = vadd.f32 1.0, %v1654_v52  ;;  %vm1658_vm10 = vcmp.lt.f32.partialorder %v1657_v4, 0.0004427343 }
 0x3d4   :  { %v1650_v60 = vsel %vm1649_vm9, %v1647_v56, %v1644_v57  ;;  %v1445_v61 = vand.u32 2147483647, %v3178_v59  ;;  %1390 = vmatmul.bf16.gmra.mxu1 %v1242_v58  ;;  %v1413_v54 = vmax.f32 %v3178_v59, 0.0 }
 0x3d5   :  { %v1858_v12 = vadd.f32 %v1650_v60, %v1410_v46  ;;  %v1191_v0 = vpop.f32.mrf.mxu0  ;;  %v1656_v10 = vmul.f32 %v2380_v51, %v1655_v3 }
 0x3d6   :  { %v1477_v55 = vsub.f32 0.0, %v1445_v61  ;;  %v1192_v2 = vadd.f32 %v3046_v44, %v1191_v0 }
 0x3d7   :  { %1890 = vst [vmem:[%s3358_s10 + $0x48] sm:$0xff] %v1858_v12 }
 0x3d8   :  { %v2384_v5 = vpop.eup %2383  ;;  %v1521_v6 = vmul.f32 1.442695, %v1477_v55  ;;  %v1226_v17 = vmax.f32 %v1192_v2, 0.0 }
 0x3d9   :  { %v2386_v8 = vpop.eup %2385  ;;  %v1660_v1 = vadd.f32 1.0, %v2384_v5  ;;  %v1663_v50 = vmul.f32 -0.5, %v2384_v5  ;;  %v1353_v62 = vpop.f32.mrf.mxu1  ;;  %v1666_v43 = vand.u32 2147483647, %v2384_v5 }
 0x3da   :  { %v1653_v9 = vmul.f32 0.6931472, %v2386_v8  ;;  %2387 = vpow2.f32 %v1521_v6  ;;  %v3186_v11 = vadd.f32 %v3083_v23, %v1353_v62 }
 0x3db   :  { %2389 = vlog2.f32 %v1660_v1  ;;  %v1664_v18 = vadd.f32 1.0, %v1663_v50  ;;  %vm1667_vm11 = vcmp.lt.f32.partialorder %v1666_v43, 0.0004427343 }
 0x3dc   :  { %v1659_v14 = vsel %vm1658_vm10, %v1656_v10, %v1653_v9  ;;  %v1446_v15 = vand.u32 2147483647, %v3186_v11 }
 0x3dd   :  { %v1859_v16 = vadd.f32 %v1659_v14, %v1411_v26  ;;  %v1193_v20 = vpop.f32.mrf.mxu0  ;;  %v1665_v27 = vmul.f32 %v2384_v5, %v1664_v18  ;;  %v1414_v5 = vmax.f32 %v3186_v11, 0.0 }
 0x3de   :  { %v1478_v21 = vsub.f32 0.0, %v1446_v15  ;;  %v1194_v30 = vadd.f32 %v3046_v44, %v1193_v20  ;;  %v1412_v44 = vmax.f32 %v3168_v36, 0.0 }
 0x3df   :  { %1891 = vst [vmem:[%s3358_s10 + $0x50] sm:$0xff] %v1859_v16 }
 0x3e0   :  { %v2388_v53 = vpop.eup %2387  ;;  %v1523_v7 = vmul.f32 1.442695, %v1478_v21  ;;  %v1227_v24 = vmax.f32 %v1194_v30, 0.0 }
 0x3e1   :  { %v2390_v25 = vpop.eup %2389  ;;  %v1669_v31 = vadd.f32 1.0, %v2388_v53  ;;  %v1672_v22 = vmul.f32 -0.5, %v2388_v53  ;;  %v1356_v13 = vpop.f32.mrf.mxu1  ;;  %v1675_v45 = vand.u32 2147483647, %v2388_v53 }
 0x3e2   :  { %v1662_v32 = vmul.f32 0.6931472, %v2390_v25  ;;  %2391 = vpow2.f32 %v1523_v7  ;;  %v1243_v35 = vpack.c.bf16 %v1227_v24, %v1226_v17  ;;  %v3196_v29 = vadd.f32 %v3083_v23, %v1356_v13 }
 0x3e3   :  { %2393 = vlog2.f32 %v1669_v31  ;;  %v1673_v39 = vadd.f32 1.0, %v1672_v22  ;;  %vm1676_vm12 = vcmp.lt.f32.partialorder %v1675_v45, 0.0004427343 }
 0x3e4   :  { %v1668_v19 = vsel %vm1667_vm11, %v1665_v27, %v1662_v32  ;;  %v1447_v38 = vand.u32 2147483647, %v3196_v29  ;;  %1395 = vmatmul.bf16.gmra.mxu1 %v1243_v35  ;;  %v1415_v21 = vmax.f32 %v3196_v29, 0.0 }
 0x3e5   :  { %v1860_v37 = vadd.f32 %v1668_v19, %v1412_v44  ;;  %v1674_v49 = vmul.f32 %v2388_v53, %v1673_v39 }
 0x3e6   :  { %v1479_v40 = vsub.f32 0.0, %v1447_v38 }
 0x3e7   :  { %1892 = vst [vmem:[%s3358_s10 + $0x58] sm:$0xff] %v1860_v37 }
 0x3e8   :  { %v2392_v47 = vpop.eup %2391  ;;  %v1525_v28 = vmul.f32 1.442695, %v1479_v40 }
 0x3e9   :  { %v2394_v48 = vpop.eup %2393  ;;  %v1678_v51 = vadd.f32 1.0, %v2392_v47  ;;  %v1358_v36 = vpop.f32.mrf.mxu1  ;;  %v1681_v34 = vmul.f32 -0.5, %v2392_v47  ;;  %v1684_v58 = vand.u32 2147483647, %v2392_v47 }
 0x3ea   :  { %v1671_v42 = vmul.f32 0.6931472, %v2394_v48  ;;  %2395 = vpow2.f32 %v1525_v28  ;;  %v3204_v33 = vadd.f32 %v3083_v23, %v1358_v36 }
 0x3eb   :  { %2397 = vlog2.f32 %v1678_v51  ;;  %v1682_v41 = vadd.f32 1.0, %v1681_v34  ;;  %vm1685_vm13 = vcmp.lt.f32.partialorder %v1684_v58, 0.0004427343 }
 0x3ec   :  { %v1677_v56 = vsel %vm1676_vm12, %v1674_v49, %v1671_v42  ;;  %v1448_v63 = vand.u32 2147483647, %v3204_v33  ;;  %v1416_v19 = vmax.f32 %v3204_v33, 0.0 }
 0x3ed   :  { %v1861_v52 = vadd.f32 %v1677_v56, %v1413_v54  ;;  %v1683_v55 = vmul.f32 %v2392_v47, %v1682_v41 }
 0x3ee   :  { %v1480_v57 = vsub.f32 0.0, %v1448_v63 }
 0x3ef   :  { %1893 = vst [vmem:[%s3358_s10 + $0x60] sm:$0xff] %v1861_v52 }
 0x3f0   :  { %v2396_v46 = vpop.eup %2395  ;;  %v1527_v60 = vmul.f32 1.442695, %v1480_v57 }
 0x3f1   :  { %v2398_v61 = vpop.eup %2397  ;;  %v1687_v12 = vadd.f32 1.0, %v2396_v46  ;;  %v1690_v0 = vmul.f32 -0.5, %v2396_v46  ;;  %v1361_v3 = vpop.f32.mrf.mxu1  ;;  %v1693_v9 = vand.u32 2147483647, %v2396_v46 }
 0x3f2   :  { %v1680_v59 = vmul.f32 0.6931472, %v2398_v61  ;;  %2399 = vpow2.f32 %v1527_v60  ;;  %v3212_v4 = vadd.f32 %v3083_v23, %v1361_v3 }
 0x3f3   :  { %2401 = vlog2.f32 %v1687_v12  ;;  %v1691_v50 = vadd.f32 1.0, %v1690_v0  ;;  %vm1694_vm14 = vcmp.lt.f32.partialorder %v1693_v9, 0.0004427343 }
 0x3f4   :  { %v1686_v6 = vsel %vm1685_vm13, %v1683_v55, %v1680_v59  ;;  %v1449_v8 = vand.u32 2147483647, %v3212_v4  ;;  %v1417_v56 = vmax.f32 %v3212_v4, 0.0 }
 0x3f5   :  { %v1862_v1 = vadd.f32 %v1686_v6, %v1414_v5  ;;  %v1692_v2 = vmul.f32 %v2396_v46, %v1691_v50 }
 0x3f6   :  { %v1481_v62 = vsub.f32 0.0, %v1449_v8 }
 0x3f7   :  { %1894 = vst [vmem:[%s3358_s10 + $0x68] sm:$0xff] %v1862_v1 }
 0x3f8   :  { %v2400_v10 = vpop.eup %2399  ;;  %v1529_v26 = vmul.f32 1.442695, %v1481_v62 }
 0x3f9   :  { %v2402_v14 = vpop.eup %2401  ;;  %v1696_v15 = vadd.f32 1.0, %v2400_v10  ;;  %v1363_v16 = vpop.f32.mrf.mxu1  ;;  %v1699_v18 = vmul.f32 -0.5, %v2400_v10  ;;  %v1702_v24 = vand.u32 2147483647, %v2400_v10 }
 0x3fa   :  { %v1689_v11 = vmul.f32 0.6931472, %v2402_v14  ;;  %2403 = vpow2.f32 %v1529_v26  ;;  %v3220_v20 = vadd.f32 %v3083_v23, %v1363_v16 }
 0x3fb   :  { %2405 = vlog2.f32 %v1696_v15  ;;  %v1700_v17 = vadd.f32 1.0, %v1699_v18  ;;  %vm1703_vm15 = vcmp.lt.f32.partialorder %v1702_v24, 0.0004427343 }
 0x3fc   :  { %v1695_v30 = vsel %vm1694_vm14, %v1692_v2, %v1689_v11  ;;  %v1450_v43 = vand.u32 2147483647, %v3220_v20  ;;  %v1418_v6 = vmax.f32 %v3220_v20, 0.0 }
 0x3fd   :  { %v1863_v53 = vadd.f32 %v1695_v30, %v1415_v21  ;;  %v1701_v29 = vmul.f32 %v2400_v10, %v1700_v17 }
 0x3fe   :  { %v1482_v7 = vsub.f32 0.0, %v1450_v43 }
 0x3ff   :  { %1895 = vst [vmem:[%s3358_s10 + $0x70] sm:$0xff] %v1863_v53 }
 0x400   :  { %v2404_v25 = vpop.eup %2403  ;;  %v1531_v27 = vmul.f32 1.442695, %v1482_v7 }
 0x401   :  { %v2406_v31 = vpop.eup %2405  ;;  %v1705_v22 = vadd.f32 1.0, %v2404_v25  ;;  %v1708_v13 = vmul.f32 -0.5, %v2404_v25  ;;  %v1366_v32 = vpop.f32.mrf.mxu1  ;;  %v1711_v47 = vand.u32 2147483647, %v2404_v25 }
 0x402   :  { %v1698_v35 = vmul.f32 0.6931472, %v2406_v31  ;;  %2407 = vpow2.f32 %v1531_v27  ;;  %v3228_v44 = vadd.f32 %v3083_v23, %v1366_v32 }
 0x403   :  { %2409 = vlog2.f32 %v1705_v22  ;;  %v1709_v40 = vadd.f32 1.0, %v1708_v13  ;;  %vm1712_vm0 = vcmp.lt.f32.partialorder %v1711_v47, 0.0004427343 }
 0x404   :  { %v1704_v38 = vsel %vm1703_vm15, %v1701_v29, %v1698_v35  ;;  %v1451_v37 = vand.u32 2147483647, %v3228_v44  ;;  %v1419_v30 = vmax.f32 %v3228_v44, 0.0 }
 0x405   :  { %v1864_v39 = vadd.f32 %v1704_v38, %v1416_v19  ;;  %v1710_v51 = vmul.f32 %v2404_v25, %v1709_v40 }
 0x406   :  { %v1483_v45 = vsub.f32 0.0, %v1451_v37 }
 0x407   :  { %1896 = vst [vmem:[%s3358_s10 + $0x78] sm:$0xff] %v1864_v39 }
 0x408   :  { %v2408_v28 = vpop.eup %2407  ;;  %v1533_v48 = vmul.f32 1.442695, %v1483_v45 }
 0x409   :  { %v2410_v49 = vpop.eup %2409  ;;  %v1714_v36 = vadd.f32 1.0, %v2408_v28  ;;  %v1368_v42 = vpop.f32.mrf.mxu1  ;;  %v1717_v33 = vmul.f32 -0.5, %v2408_v28  ;;  %v1720_v46 = vand.u32 2147483647, %v2408_v28 }
 0x40a   :  { %v1707_v34 = vmul.f32 0.6931472, %v2410_v49  ;;  %2411 = vpow2.f32 %v1533_v48  ;;  %v3236_v54 = vadd.f32 %v3083_v23, %v1368_v42 }
 0x40b   :  { %2413 = vlog2.f32 %v1714_v36  ;;  %v1718_v57 = vadd.f32 1.0, %v1717_v33  ;;  %vm1721_vm1 = vcmp.lt.f32.partialorder %v1720_v46, 0.0004427343 }
 0x40c   :  { %v1713_v63 = vsel %vm1712_vm0, %v1710_v51, %v1707_v34  ;;  %v1452_v52 = vand.u32 2147483647, %v3236_v54  ;;  %v1420_v38 = vmax.f32 %v3236_v54, 0.0 }
 0x40d   :  { %v1865_v41 = vadd.f32 %v1713_v63, %v1417_v56  ;;  %v1719_v4 = vmul.f32 %v2408_v28, %v1718_v57 }
 0x40e   :  { %v1484_v58 = vsub.f32 0.0, %v1452_v52 }
 0x40f   :  { %1897 = vst [vmem:[%s3358_s10 + $0x80] sm:$0xff] %v1865_v41 }
 0x410   :  { %v2412_v60 = vpop.eup %2411  ;;  %v1535_v61 = vmul.f32 1.442695, %v1484_v58 }
 0x411   :  { %v2414_v12 = vpop.eup %2413  ;;  %v1723_v0 = vadd.f32 1.0, %v2412_v60  ;;  %v1726_v3 = vmul.f32 -0.5, %v2412_v60  ;;  %v1371_v59 = vpop.f32.mrf.mxu1  ;;  %v1729_v10 = vand.u32 2147483647, %v2412_v60 }
 0x412   :  { %v1716_v55 = vmul.f32 0.6931472, %v2414_v12  ;;  %2415 = vpow2.f32 %v1535_v61  ;;  %v3244_v5 = vadd.f32 %v3083_v23, %v1371_v59 }
 0x413   :  { %2417 = vlog2.f32 %v1723_v0  ;;  %v1727_v62 = vadd.f32 1.0, %v1726_v3  ;;  %vm1730_vm2 = vcmp.lt.f32.partialorder %v1729_v10, 0.0004427343 }
 0x414   :  { %v1722_v8 = vsel %vm1721_vm1, %v1719_v4, %v1716_v55  ;;  %v1453_v1 = vand.u32 2147483647, %v3244_v5  ;;  %v1421_v63 = vmax.f32 %v3244_v5, 0.0  ;;  %v3278_v5 = vld [vmem:[%s3357_s9] ss:$0 sm:$0xff] }
 0x415   :  { %v1866_v50 = vadd.f32 %v1722_v8, %v1418_v6  ;;  %v1728_v15 = vmul.f32 %v2412_v60, %v1727_v62 }
 0x416   :  { %v1485_v9 = vsub.f32 0.0, %v1453_v1 }
 0x417   :  { %1898 = vst [vmem:[%s3358_s10 + $0x88] sm:$0xff] %v1866_v50 }
 0x418   :  { %v2416_v26 = vpop.eup %2415  ;;  %v1537_v14 = vmul.f32 1.442695, %v1485_v9 }
 0x419   :  { %v2418_v2 = vpop.eup %2417  ;;  %v1732_v16 = vadd.f32 1.0, %v2416_v26  ;;  %v1373_v11 = vpop.f32.mrf.mxu1  ;;  %v1735_v20 = vmul.f32 -0.5, %v2416_v26  ;;  %v1738_v25 = vand.u32 2147483647, %v2416_v26 }
 0x41a   :  { %v1725_v18 = vmul.f32 0.6931472, %v2418_v2  ;;  %2419 = vpow2.f32 %v1537_v14  ;;  %v3252_v21 = vadd.f32 %v3083_v23, %v1373_v11 }
 0x41b   :  { %2421 = vlog2.f32 %v1732_v16  ;;  %v1736_v7 = vadd.f32 1.0, %v1735_v20  ;;  %vm1739_vm3 = vcmp.lt.f32.partialorder %v1738_v25, 0.0004427343 }
 0x41c   :  { %v1731_v43 = vsel %vm1730_vm2, %v1728_v15, %v1725_v18  ;;  %v1454_v53 = vand.u32 2147483647, %v3252_v21  ;;  %v1422_v8 = vmax.f32 %v3252_v21, 0.0 }
 0x41d   :  { %v1867_v17 = vadd.f32 %v1731_v43, %v1419_v30  ;;  %v1737_v44 = vmul.f32 %v2416_v26, %v1736_v7 }
 0x41e   :  { %v1486_v24 = vsub.f32 0.0, %v1454_v53 }
 0x41f   :  { %1899 = vst [vmem:[%s3358_s10 + $0x90] sm:$0xff] %v1867_v17 }
 0x420   :  { %v2420_v27 = vpop.eup %2419  ;;  %v1539_v31 = vmul.f32 1.442695, %v1486_v24 }
 0x421   :  { %v2422_v22 = vpop.eup %2421  ;;  %v1741_v13 = vadd.f32 1.0, %v2420_v27  ;;  %v1744_v32 = vmul.f32 -0.5, %v2420_v27  ;;  %v1376_v35 = vpop.f32.mrf.mxu1  ;;  %v1747_v28 = vand.u32 2147483647, %v2420_v27 }
 0x422   :  { %v1734_v29 = vmul.f32 0.6931472, %v2422_v22  ;;  %2423 = vpow2.f32 %v1539_v31  ;;  %v3260_v19 = vadd.f32 %v3083_v23, %v1376_v35 }
 0x423   :  { %2425 = vlog2.f32 %v1741_v13  ;;  %v1745_v45 = vadd.f32 1.0, %v1744_v32  ;;  %vm1748_vm4 = vcmp.lt.f32.partialorder %v1747_v28, 0.0004427343 }
 0x424   :  { %v1740_v37 = vsel %vm1739_vm3, %v1737_v44, %v1734_v29  ;;  %v1455_v39 = vand.u32 2147483647, %v3260_v19  ;;  %v1423_v43 = vmax.f32 %v3260_v19, 0.0 }
 0x425   :  { %v1868_v40 = vadd.f32 %v1740_v37, %v1420_v38  ;;  %v1746_v36 = vmul.f32 %v2420_v27, %v1745_v45 }
 0x426   :  { %v1487_v47 = vsub.f32 0.0, %v1455_v39 }
 0x427   :  { %1900 = vst [vmem:[%s3358_s10 + $0x98] sm:$0xff] %v1868_v40 }
 0x428   :  { %v2424_v48 = vpop.eup %2423  ;;  %v1541_v49 = vmul.f32 1.442695, %v1487_v47 }
 0x429   :  { %v2426_v51 = vpop.eup %2425  ;;  %v1750_v42 = vadd.f32 1.0, %v2424_v48  ;;  %v1378_v34 = vpop.f32.mrf.mxu1  ;;  %v1753_v54 = vmul.f32 -0.5, %v2424_v48  ;;  %v1756_v60 = vand.u32 2147483647, %v2424_v48 }
 0x42a   :  { %v1743_v33 = vmul.f32 0.6931472, %v2426_v51  ;;  %2427 = vpow2.f32 %v1541_v49  ;;  %v3268_v56 = vadd.f32 %v3083_v23, %v1378_v34 }
 0x42b   :  { %2429 = vlog2.f32 %v1750_v42  ;;  %v1754_v58 = vadd.f32 1.0, %v1753_v54  ;;  %vm1757_vm5 = vcmp.lt.f32.partialorder %v1756_v60, 0.0004427343 }
 0x42c   :  { %v1749_v52 = vsel %vm1748_vm4, %v1746_v36, %v1743_v33  ;;  %v1456_v41 = vand.u32 2147483647, %v3268_v56  ;;  %v1424_v37 = vmax.f32 %v3268_v56, 0.0 }
 0x42d   :  { %v1869_v57 = vadd.f32 %v1749_v52, %v1421_v63  ;;  %v1755_v4 = vmul.f32 %v2424_v48, %v1754_v58 }
 0x42e   :  { %v1488_v46 = vsub.f32 0.0, %v1456_v41 }
 0x42f   :  { %1901 = vst [vmem:[%s3358_s10 + $0xa0] sm:$0xff] %v1869_v57 }
 0x430   :  { %v2428_v61 = vpop.eup %2427  ;;  %v1543_v12 = vmul.f32 1.442695, %v1488_v46 }
 0x431   :  { %v2430_v0 = vpop.eup %2429  ;;  %v1759_v23 = vadd.f32 1.0, %v2428_v61  ;;  %v1762_v3 = vmul.f32 -0.5, %v2428_v61  ;;  %v1381_v59 = vpop.f32.mrf.mxu1  ;;  %v1765_v26 = vand.u32 2147483647, %v2428_v61 }
 0x432   :  { %v1752_v55 = vmul.f32 0.6931472, %v2430_v0  ;;  %2431 = vpow2.f32 %v1543_v12  ;;  %v3281_v6 = vadd.f32 %v3278_v5, %v1381_v59 }
 0x433   :  { %2433 = vlog2.f32 %v1759_v23  ;;  %v1763_v9 = vadd.f32 1.0, %v1762_v3  ;;  %vm1766_vm6 = vcmp.lt.f32.partialorder %v1765_v26, 0.0004427343 }
 0x434   :  { %v1758_v1 = vsel %vm1757_vm5, %v1755_v4, %v1752_v55  ;;  %v1457_v50 = vand.u32 2147483647, %v3281_v6  ;;  %v1425_v52 = vmax.f32 %v3281_v6, 0.0 }
 0x435   :  { %v1870_v62 = vadd.f32 %v1758_v1, %v1422_v8  ;;  %v1764_v16 = vmul.f32 %v2428_v61, %v1763_v9 }
 0x436   :  { %v1489_v10 = vsub.f32 0.0, %v1457_v50 }
 0x437   :  { %1902 = vst [vmem:[%s3358_s10 + $0xa8] sm:$0xff] %v1870_v62 }
 0x438   :  { %v2432_v14 = vpop.eup %2431  ;;  %v1545_v2 = vmul.f32 1.442695, %v1489_v10 }
 0x439   :  { %v2434_v15 = vpop.eup %2433  ;;  %v1768_v11 = vadd.f32 1.0, %v2432_v14  ;;  %v1383_v18 = vpop.f32.mrf.mxu1  ;;  %v1771_v21 = vmul.f32 -0.5, %v2432_v14  ;;  %v1774_v27 = vand.u32 2147483647, %v2432_v14 }
 0x43a   :  { %v1761_v20 = vmul.f32 0.6931472, %v2434_v15  ;;  %2435 = vpow2.f32 %v1545_v2  ;;  %v3289_v30 = vadd.f32 %v3278_v5, %v1383_v18 }
 0x43b   :  { %2437 = vlog2.f32 %v1768_v11  ;;  %v1772_v24 = vadd.f32 1.0, %v1771_v21  ;;  %vm1775_vm7 = vcmp.lt.f32.partialorder %v1774_v27, 0.0004427343 }
 0x43c   :  { %v1767_v53 = vsel %vm1766_vm6, %v1764_v16, %v1761_v20  ;;  %v1458_v17 = vand.u32 2147483647, %v3289_v30  ;;  %v1426_v1 = vmax.f32 %v3289_v30, 0.0 }
 0x43d   :  { %v1871_v7 = vadd.f32 %v1767_v53, %v1423_v43  ;;  %v1773_v19 = vmul.f32 %v2432_v14, %v1772_v24 }
 0x43e   :  { %v1490_v25 = vsub.f32 0.0, %v1458_v17 }
 0x43f   :  { %1903 = vst [vmem:[%s3358_s10 + $0xb0] sm:$0xff] %v1871_v7 }
 0x440   :  { %v2436_v31 = vpop.eup %2435  ;;  %v1547_v22 = vmul.f32 1.442695, %v1490_v25 }
 0x441   :  { %v2438_v13 = vpop.eup %2437  ;;  %v1777_v32 = vadd.f32 1.0, %v2436_v31  ;;  %v1780_v35 = vmul.f32 -0.5, %v2436_v31  ;;  %v1386_v29 = vpop.f32.mrf.mxu1  ;;  %v1783_v48 = vand.u32 2147483647, %v2436_v31 }
 0x442   :  { %v1770_v44 = vmul.f32 0.6931472, %v2438_v13  ;;  %2439 = vpow2.f32 %v1547_v22  ;;  %v3297_v38 = vadd.f32 %v3278_v5, %v1386_v29 }
 0x443   :  { %2441 = vlog2.f32 %v1777_v32  ;;  %v1781_v47 = vadd.f32 1.0, %v1780_v35  ;;  %vm1784_vm8 = vcmp.lt.f32.partialorder %v1783_v48, 0.0004427343 }
 0x444   :  { %v1776_v39 = vsel %vm1775_vm7, %v1773_v19, %v1770_v44  ;;  %v1459_v40 = vand.u32 2147483647, %v3297_v38  ;;  %v1427_v53 = vmax.f32 %v3297_v38, 0.0 }
 0x445   :  { %v1872_v45 = vadd.f32 %v1776_v39, %v1424_v37  ;;  %v1782_v42 = vmul.f32 %v2436_v31, %v1781_v47 }
 0x446   :  { %v1491_v28 = vsub.f32 0.0, %v1459_v40 }
 0x447   :  { %1904 = vst [vmem:[%s3358_s10 + $0xb8] sm:$0xff] %v1872_v45 }
 0x448   :  { %v2440_v49 = vpop.eup %2439  ;;  %v1549_v51 = vmul.f32 1.442695, %v1491_v28 }
 0x449   :  { %v2442_v36 = vpop.eup %2441  ;;  %v1786_v34 = vadd.f32 1.0, %v2440_v49  ;;  %v1388_v33 = vpop.f32.mrf.mxu1  ;;  %v1789_v56 = vmul.f32 -0.5, %v2440_v49  ;;  %v1792_v61 = vand.u32 2147483647, %v2440_v49 }
 0x44a   :  { %v1779_v54 = vmul.f32 0.6931472, %v2442_v36  ;;  %2443 = vpow2.f32 %v1549_v51  ;;  %v3305_v63 = vadd.f32 %v3278_v5, %v1388_v33 }
 0x44b   :  { %2445 = vlog2.f32 %v1786_v34  ;;  %v1790_v46 = vadd.f32 1.0, %v1789_v56  ;;  %vm1793_vm9 = vcmp.lt.f32.partialorder %v1792_v61, 0.0004427343 }
 0x44c   :  { %v1785_v41 = vsel %vm1784_vm8, %v1782_v42, %v1779_v54  ;;  %v1460_v57 = vand.u32 2147483647, %v3305_v63  ;;  %v1428_v39 = vmax.f32 %v3305_v63, 0.0 }
 0x44d   :  { %v1873_v58 = vadd.f32 %v1785_v41, %v1425_v52  ;;  %v1791_v6 = vmul.f32 %v2440_v49, %v1790_v46 }
 0x44e   :  { %v1492_v60 = vsub.f32 0.0, %v1460_v57 }
 0x44f   :  { %1905 = vst [vmem:[%s3358_s10 + $0xc0] sm:$0xff] %v1873_v58 }
 0x450   :  { %v2444_v12 = vpop.eup %2443  ;;  %v1551_v0 = vmul.f32 1.442695, %v1492_v60 }
 0x451   :  { %v2446_v23 = vpop.eup %2445  ;;  %v1795_v3 = vadd.f32 1.0, %v2444_v12  ;;  %v1798_v59 = vmul.f32 -0.5, %v2444_v12  ;;  %v1391_v55 = vpop.f32.mrf.mxu1  ;;  %v1801_v14 = vand.u32 2147483647, %v2444_v12 }
 0x452   :  { %v1788_v4 = vmul.f32 0.6931472, %v2446_v23  ;;  %2447 = vpow2.f32 %v1551_v0  ;;  %v3313_v8 = vadd.f32 %v3278_v5, %v1391_v55 }
 0x453   :  { %2449 = vlog2.f32 %v1795_v3  ;;  %v1799_v10 = vadd.f32 1.0, %v1798_v59  ;;  %vm1802_vm10 = vcmp.lt.f32.partialorder %v1801_v14, 0.0004427343 }
 0x454   :  { %v1794_v50 = vsel %vm1793_vm9, %v1791_v6, %v1788_v4  ;;  %v1461_v62 = vand.u32 2147483647, %v3313_v8  ;;  %v1429_v41 = vmax.f32 %v3313_v8, 0.0 }
 0x455   :  { %v1874_v9 = vadd.f32 %v1794_v50, %v1426_v1  ;;  %v1800_v11 = vmul.f32 %v2444_v12, %v1799_v10 }
 0x456   :  { %v1493_v26 = vsub.f32 0.0, %v1461_v62 }
 0x457   :  { %1906 = vst [vmem:[%s3358_s10 + $0xc8] sm:$0xff] %v1874_v9 }
 0x458   :  { %v2448_v2 = vpop.eup %2447  ;;  %v1553_v15 = vmul.f32 1.442695, %v1493_v26 }
 0x459   :  { %v2450_v16 = vpop.eup %2449  ;;  %v1804_v18 = vadd.f32 1.0, %v2448_v2  ;;  %v1393_v20 = vpop.f32.mrf.mxu1  ;;  %v1807_v30 = vmul.f32 -0.5, %v2448_v2  ;;  %v1810_v31 = vand.u32 2147483647, %v2448_v2 }
 0x45a   :  { %v1797_v21 = vmul.f32 0.6931472, %v2450_v16  ;;  %2451 = vpow2.f32 %v1553_v15  ;;  %v3321_v43 = vadd.f32 %v3278_v5, %v1393_v20 }
 0x45b   :  { %2453 = vlog2.f32 %v1804_v18  ;;  %v1808_v25 = vadd.f32 1.0, %v1807_v30  ;;  %vm1811_vm11 = vcmp.lt.f32.partialorder %v1810_v31, 0.0004427343 }
 0x45c   :  { %v1803_v17 = vsel %vm1802_vm10, %v1800_v11, %v1797_v21  ;;  %v1462_v7 = vand.u32 2147483647, %v3321_v43  ;;  %v1430_v6 = vmax.f32 %v3321_v43, 0.0 }
 0x45d   :  { %v1875_v24 = vadd.f32 %v1803_v17, %v1427_v53  ;;  %v1809_v38 = vmul.f32 %v2448_v2, %v1808_v25 }
 0x45e   :  { %v1494_v27 = vsub.f32 0.0, %v1462_v7 }
 0x45f   :  { %1907 = vst [vmem:[%s3358_s10 + $0xd0] sm:$0xff] %v1875_v24 }
 0x460   :  { %v2452_v22 = vpop.eup %2451  ;;  %v1555_v13 = vmul.f32 1.442695, %v1494_v27 }
 0x461   :  { %v2454_v32 = vpop.eup %2453  ;;  %v1813_v35 = vadd.f32 1.0, %v2452_v22  ;;  %v1816_v29 = vmul.f32 -0.5, %v2452_v22  ;;  %v1396_v44 = vpop.f32.mrf.mxu1  ;;  %v1819_v49 = vand.u32 2147483647, %v2452_v22 }
 0x462   :  { %v1806_v19 = vmul.f32 0.6931472, %v2454_v32  ;;  %2455 = vpow2.f32 %v1555_v13  ;;  %v1397_v37 = vadd.f32 %v3278_v5, %v1396_v44 }
 0x463   :  { %2457 = vlog2.f32 %v1813_v35  ;;  %v1817_v28 = vadd.f32 1.0, %v1816_v29  ;;  %vm1820_vm12 = vcmp.lt.f32.partialorder %v1819_v49, 0.0004427343 }
 0x464   :  { %v1812_v40 = vsel %vm1811_vm11, %v1809_v38, %v1806_v19  ;;  %v1463_v45 = vand.u32 2147483647, %v1397_v37  ;;  %v1431_v16 = vmax.f32 %v1397_v37, 0.0 }
 0x465   :  { %v1876_v47 = vadd.f32 %v1812_v40, %v1428_v39  ;;  %v1818_v34 = vmul.f32 %v2452_v22, %v1817_v28 }
 0x466   :  { %v1495_v48 = vsub.f32 0.0, %v1463_v45 }
 0x467   :  { %1908 = vst [vmem:[%s3358_s10 + $0xd8] sm:$0xff] %v1876_v47 }
 0x468   :  { %v2456_v51 = vpop.eup %2455  ;;  %v1557_v36 = vmul.f32 1.442695, %v1495_v48 }
 0x469   :  { %v2458_v42 = vpop.eup %2457  ;;  %v1822_v33 = vadd.f32 1.0, %v2456_v51  ;;  %v1398_v54 = vpop.f32.mrf.mxu1  ;;  %v1825_v63 = vmul.f32 -0.5, %v2456_v51  ;;  %v1828_v12 = vand.u32 2147483647, %v2456_v51 }
 0x46a   :  { %v1815_v56 = vmul.f32 0.6931472, %v2458_v42  ;;  %2459 = vpow2.f32 %v1557_v36  ;;  %v1399_v52 = vadd.f32 %v3278_v5, %v1398_v54 }
 0x46b   :  { %2461 = vlog2.f32 %v1822_v33  ;;  %v1826_v60 = vadd.f32 1.0, %v1825_v63  ;;  %vm1829_vm13 = vcmp.lt.f32.partialorder %v1828_v12, 0.0004427343 }
 0x46c   :  { %v1821_v57 = vsel %vm1820_vm12, %v1818_v34, %v1815_v56  ;;  %v1464_v58 = vand.u32 2147483647, %v1399_v52  ;;  %v1432_v17 = vmax.f32 %v1399_v52, 0.0 }
 0x46d   :  { %v1877_v46 = vadd.f32 %v1821_v57, %v1429_v41  ;;  %v1827_v5 = vmul.f32 %v2456_v51, %v1826_v60 }
 0x46e   :  { %v1496_v61 = vsub.f32 0.0, %v1464_v58 }
 0x46f   :  { %1909 = vst [vmem:[%s3358_s10 + $0xe0] sm:$0xff] %v1877_v46 }
 0x470   :  { %v2460_v0 = vpop.eup %2459  ;;  %v1559_v23 = vmul.f32 1.442695, %v1496_v61 }
 0x471   :  { %v2462_v3 = vpop.eup %2461  ;;  %v1831_v59 = vadd.f32 1.0, %v2460_v0  ;;  %v1834_v4 = vmul.f32 -0.5, %v2460_v0  ;;  %v1837_v62 = vand.u32 2147483647, %v2460_v0 }
 0x472   :  { %v1824_v55 = vmul.f32 0.6931472, %v2462_v3  ;;  %2463 = vpow2.f32 %v1559_v23 }
 0x473   :  { %2465 = vlog2.f32 %v1831_v59  ;;  %v1835_v50 = vadd.f32 1.0, %v1834_v4  ;;  %vm1838_vm14 = vcmp.lt.f32.partialorder %v1837_v62, 0.0004427343 }
 0x474   :  { %v1830_v8 = vsel %vm1829_vm13, %v1827_v5, %v1824_v55 }
 0x475   :  { %v1878_v1 = vadd.f32 %v1830_v8, %v1430_v6  ;;  %v1836_v2 = vmul.f32 %v2460_v0, %v1835_v50 }
 0x477   :  { %1910 = vst [vmem:[%s3358_s10 + $0xe8] sm:$0xff] %v1878_v1 }
 0x478   :  { %v2464_v9 = vpop.eup %2463 }
 0x479   :  { %v2466_v10 = vpop.eup %2465  ;;  %v1840_v26 = vadd.f32 1.0, %v2464_v9  ;;  %v1843_v15 = vmul.f32 -0.5, %v2464_v9  ;;  %v1846_v21 = vand.u32 2147483647, %v2464_v9 }
 0x47a   :  { %v1833_v14 = vmul.f32 0.6931472, %v2466_v10 }
 0x47b   :  { %2467 = vlog2.f32 %v1840_v26  ;;  %v1844_v20 = vadd.f32 1.0, %v1843_v15  ;;  %vm1847_vm15 = vcmp.lt.f32.partialorder %v1846_v21, 0.0004427343 }
 0x47c   :  { %v1839_v11 = vsel %vm1838_vm14, %v1836_v2, %v1833_v14 }
 0x47d   :  { %v1879_v18 = vadd.f32 %v1839_v11, %v1431_v16  ;;  %v1845_v53 = vmul.f32 %v2464_v9, %v1844_v20 }
 0x47f   :  { %1911 = vst [vmem:[%s3358_s10 + $0xf0] sm:$0xff] %v1879_v18 }
 0x481   :  { %v2468_v30 = vpop.eup %2467 }
 0x482   :  { %v1842_v43 = vmul.f32 0.6931472, %v2468_v30 }
 0x484   :  { %v1848_v7 = vsel %vm1847_vm15, %v1845_v53, %v1842_v43 }
 0x485   :  { %v1880_v24 = vadd.f32 %v1848_v7, %v1432_v17 }
 0x487   :  { %1912 = vst [vmem:[%s3358_s10 + $0xf8] sm:$0xff] %v1880_v24 }
 0x488   :  { %1917 = vsyncpa [#allocation3], 1 }

</bundles_post_ra>
